<compile_context>
chip_gen: v7x
topology: tpu7x:2x2x1
jax: 0.10.0
libtpu: 0.0.40
codegen_flags: <defaults>
</compile_context>

<pallas_src>
import jax
import jax.numpy as jnp
from jax.experimental import pallas as pl
from jax.experimental.pallas import tpu as pltpu


LEAK = 0.3
D_IN = 28 * 28        # 784
H1 = 512
H2 = 256


def _discriminator_kernel(x_ref, w1_ref, b1_ref, w2_ref, b2_ref,
                          w3_ref, b3_ref, o_ref):
    """Fused 3-layer MLP on one batch tile.

    x_ref : (TB, 784) f32     w1_ref: (784, 512) bf16   b1_ref: (1, 512) f32
                              w2_ref: (512, 256) bf16   b2_ref: (1, 256) f32
                              w3_ref: (256, 1)   f32    b3_ref: (1, 1)   f32
    o_ref : (1, TB) f32  (lane-dense probabilities for this tile)
    """
    # Layer 1: Linear(784->512) on the MXU. x is cast to bf16 here (not in the
    # wrapper); accumulation is f32.
    x = x_ref[...].astype(jnp.bfloat16)
    h1 = jnp.dot(x, w1_ref[...], preferred_element_type=jnp.float32)
    h1 = h1 + b1_ref[...]
    h1 = jnp.maximum(h1, LEAK * h1)          # LeakyReLU(0.3); Dropout = id (eval)

    # Layer 2: Linear(512->256) on the MXU.
    h2 = jnp.dot(h1.astype(jnp.bfloat16), w2_ref[...],
                 preferred_element_type=jnp.float32)
    h2 = h2 + b2_ref[...]
    h2 = jnp.maximum(h2, LEAK * h2)

    # Layer 3: Linear(256->1), computed lane-major so the output is stored as
    # one dense (1, TB) row.  Transpose h2 (XLU, has slack here), multiply by
    # the w3 column (VPU, lane-broadcast) and reduce over the 256 sublanes.
    h2_t = h2.T                                           # (256, TB) f32
    logits = jnp.sum(h2_t * w3_ref[...], axis=0, keepdims=True) + b3_ref[...]
    o_ref[...] = jax.nn.sigmoid(logits)                   # (1, TB)


def _round_up(n, m):
    return ((n + m - 1) // m) * m


def _choose_tile_b(batch, tile_b):
    """Batch tile: multiple of 128 (lane-dense output), capped at 2048."""
    tb = max(128, _round_up(int(tile_b), 128))
    tb = min(tb, 2048)
    # Never make the tile (much) larger than the batch itself.
    tb = min(tb, _round_up(batch, 128))
    # Prefer >= 2 grid steps when the batch allows it: lets the "parallel"
    # grid axis use both v7x TensorCores and overlaps the x-tile DMA.
    if batch > 128:
        tb = min(tb, _round_up((batch + 1) // 2, 128))
    return tb


def prepare_params(params):
    """One-time repack of f32 params (W stored as (in, out)) into kernel layout.

    Hoisted out of the forward call so the bf16 casts / reshapes are not an
    extra HBM pass on every invocation."""
    w1, b1, w2, b2, w3, b3 = params
    return (
        jnp.asarray(w1, jnp.bfloat16).reshape(D_IN, H1),   # (784, 512) bf16
        jnp.asarray(b1, jnp.float32).reshape(1, H1),       # (1, 512)   f32
        jnp.asarray(w2, jnp.bfloat16).reshape(H1, H2),     # (512, 256) bf16
        jnp.asarray(b2, jnp.float32).reshape(1, H2),       # (1, 256)   f32
        jnp.asarray(w3, jnp.float32).reshape(H2, 1),       # (256, 1)   f32
        jnp.asarray(b3, jnp.float32).reshape(1, 1),        # (1, 1)     f32
    )


def discriminator_forward(img, prepared_params, *, tile_b=2048):
    """img: (B, 784) float32.  Returns (B, 1) float32 probabilities."""
    w1p, b1r, w2p, b2r, w3c, b3r = prepared_params
    B, D = img.shape
    assert D == D_IN, D

    tb = _choose_tile_b(B, tile_b)
    num_tiles = pl.cdiv(B, tb)          # partial last tile handled by Pallas
    grid = (num_tiles,)

    # Weights / biases are grid-invariant (constant index_map) -> DMA'd once.
    full = lambda shape: pl.BlockSpec(shape, lambda i: (0,) * len(shape))

    out = pl.pallas_call(
        _discriminator_kernel,
        # Lane-dense output: one (1, tb) row per grid step.
        out_shape=jax.ShapeDtypeStruct((num_tiles, tb), jnp.float32),
        grid=grid,
        in_specs=[
            pl.BlockSpec((tb, D_IN), lambda i: (i, 0)),    # x tile over batch (f32)
            full((D_IN, H1)),                              # W1 (bf16, resident)
            full((1, H1)),                                 # b1
            full((H1, H2)),                                # W2 (bf16, resident)
            full((1, H2)),                                 # b2
            full((H2, 1)),                                 # w3 as a column vector
            full((1, 1)),                                  # b3
        ],
        out_specs=pl.BlockSpec((1, tb), lambda i: (i, 0)),
        compiler_params=pltpu.CompilerParams(
            # Batch tiles are independent -> megacore-shard the grid on v7x.
            dimension_semantics=("parallel",),
            # Large tiles (default 2048 rows, f32 x double-buffered + f32
            # intermediates) need more than v5e's 16 MiB scoped default;
            # 48 MiB is safe on v5e/v6e (128 MiB) and v7x (64 MiB physical).
            vmem_limit_bytes=48 * 1024 * 1024),
    )(img.astype(jnp.float32), w1p, b1r, w2p, b2r, w3c, b3r)

    # (num_tiles, tb) -> (B, 1); rows beyond B in the last tile are garbage
    # from the partial block and are sliced away here.
    return out.reshape(-1)[:B].reshape(B, 1)


def init_params(key):
    """Deterministic init mimicking PyTorch nn.Linear default U(-1/sqrt(fan_in), +).

    Weights are stored transposed vs. PyTorch: W has shape (in, out)."""
    def linear(key, fan_in, fan_out):
        kw, kb = jax.random.split(key)
        bound = 1.0 / jnp.sqrt(fan_in)
        w = jax.random.uniform(kw, (fan_in, fan_out), jnp.float32, -bound, bound)
        b = jax.random.uniform(kb, (1, fan_out), jnp.float32, -bound, bound)
        return w, b

    k1, k2, k3 = jax.random.split(key, 3)
    w1, b1 = linear(k1, D_IN, H1)
    w2, b2 = linear(k2, H1, H2)
    w3, b3 = linear(k3, H2, 1)
    return (w1, b1, w2, b2, w3, b3)


def reference_forward(img, params):
    """Pure-JAX f32 reference (PyTorch eval-mode semantics)."""
    w1, b1, w2, b2, w3, b3 = params
    h1 = img @ w1 + b1
    h1 = jnp.where(h1 > 0, h1, LEAK * h1)
    h2 = h1 @ w2 + b2
    h2 = jnp.where(h2 > 0, h2, LEAK * h2)
    return jax.nn.sigmoid(h2 @ w3 + b3)


def reference_forward_bf16(img, params):
    """Reference mirroring the kernel's bf16-matmul / f32-accumulate math."""
    w1, b1, w2, b2, w3, b3 = params
    h1 = jnp.dot(img.astype(jnp.bfloat16), w1.astype(jnp.bfloat16),
                 preferred_element_type=jnp.float32) + b1
    h1 = jnp.maximum(h1, LEAK * h1)
    h2 = jnp.dot(h1.astype(jnp.bfloat16), w2.astype(jnp.bfloat16),
                 preferred_element_type=jnp.float32) + b2
    h2 = jnp.maximum(h2, LEAK * h2)
    return jax.nn.sigmoid(h2 @ w3.reshape(H2, 1) + b3.reshape(1, 1))


if __name__ == "__main__":
    key = jax.random.PRNGKey(0)
    k_param, k_img1, k_img2 = jax.random.split(key, 3)

    params = init_params(k_param)
    prepped = prepare_params(params)      # one-time weight repack (bf16 etc.)

    # Small batch of flattened 28x28 "images".
    B = 8
    img = jax.random.uniform(k_img1, (B, D_IN), jnp.float32)
    out = jax.block_until_ready(discriminator_forward(img, prepped))
    assert out.shape == (B, 1), out.shape

    ref_bf16 = reference_forward_bf16(img, params)
    ref_f32 = reference_forward(img, params)
    assert jnp.allclose(out, ref_bf16, atol=2e-4, rtol=2e-4), (
        f"mismatch vs bf16 reference: {jnp.max(jnp.abs(out - ref_bf16))}")
    assert jnp.allclose(out, ref_f32, atol=3e-2, rtol=3e-2), (
        f"mismatch vs f32 reference: {jnp.max(jnp.abs(out - ref_f32))}")

    # Non-multiple-of-tile batch: exercises the multi-step "parallel" grid,
    # the partial last input block and the lane-dense output slice-back.
    B2 = 300
    img2 = jax.random.uniform(k_img2, (B2, D_IN), jnp.float32)
    out2 = jax.block_until_ready(
        discriminator_forward(img2, prepped, tile_b=128))
    assert out2.shape == (B2, 1), out2.shape
    ref2 = reference_forward_bf16(img2, params)
    assert jnp.allclose(out2, ref2, atol=2e-4, rtol=2e-4), (
        f"mismatch vs bf16 reference (B=300): {jnp.max(jnp.abs(out2 - ref2))}")

    print("KERNEL_OK")
</pallas_src>

<mosaic_0001>
module attributes {stable_mosaic.version = 11 : i64} {
  func.func @_discriminator_kernel(%arg0: i32, %arg1: memref<128x784xf32, #tpu.memory_space<vmem>>, %arg2: memref<784x512xbf16, #tpu.memory_space<vmem>>, %arg3: memref<1x512xf32, #tpu.memory_space<vmem>>, %arg4: memref<512x256xbf16, #tpu.memory_space<vmem>>, %arg5: memref<1x256xf32, #tpu.memory_space<vmem>>, %arg6: memref<256x1xf32, #tpu.memory_space<vmem>>, %arg7: memref<1x1xf32, #tpu.memory_space<vmem>>, %arg8: memref<1x128xf32, #tpu.memory_space<vmem>>) attributes {dimension_semantics = [#tpu.dimension_semantics<parallel>], iteration_bounds = array<i64: 1>, scalar_prefetch = 0 : i64, scratch_operands = 0 : i64, tpu.core_type = #tpu.core_type<tc>, window_params = [{transform_indices = @transform_0, window_bounds = array<i64: 128, 784>}, {pipeline_mode = #tpu.pipeline_mode<synchronous>, transform_indices = @transform_1, window_bounds = array<i64: 784, 512>}, {pipeline_mode = #tpu.pipeline_mode<synchronous>, transform_indices = @transform_2, window_bounds = array<i64: 1, 512>}, {pipeline_mode = #tpu.pipeline_mode<synchronous>, transform_indices = @transform_3, window_bounds = array<i64: 512, 256>}, {pipeline_mode = #tpu.pipeline_mode<synchronous>, transform_indices = @transform_4, window_bounds = array<i64: 1, 256>}, {pipeline_mode = #tpu.pipeline_mode<synchronous>, transform_indices = @transform_5, window_bounds = array<i64: 256, 1>}, {pipeline_mode = #tpu.pipeline_mode<synchronous>, transform_indices = @transform_6, window_bounds = array<i64: 1, 1>}, {transform_indices = @transform_7, window_bounds = array<i64: 1, 128>}]} {
    %c0 = arith.constant 0 : index
    %c0_0 = arith.constant 0 : index
    %0 = vector.load %arg1[%c0, %c0_0] : memref<128x784xf32, #tpu.memory_space<vmem>>, vector<128x784xf32>
    %1 = arith.truncf %0 : vector<128x784xf32> to vector<128x784xbf16>
    %c0_1 = arith.constant 0 : index
    %c0_2 = arith.constant 0 : index
    %2 = vector.load %arg2[%c0_1, %c0_2] : memref<784x512xbf16, #tpu.memory_space<vmem>>, vector<784x512xbf16>
    %cst = arith.constant dense<0.000000e+00> : vector<128x512xf32>
    %3 = tpu.matmul %1, %2, %cst {dimension_numbers = #tpu.dot_dimension_numbers<[1], [0], [0], [1], [0, 0, 1, 1], [], []>} : vector<128x784xbf16>, vector<784x512xbf16>, vector<128x512xf32> -> vector<128x512xf32>
    %c0_3 = arith.constant 0 : index
    %c0_4 = arith.constant 0 : index
    %4 = vector.load %arg3[%c0_3, %c0_4] : memref<1x512xf32, #tpu.memory_space<vmem>>, vector<1x512xf32>
    %5 = vector.broadcast %4 : vector<1x512xf32> to vector<128x512xf32>
    %6 = arith.addf %3, %5 : vector<128x512xf32>
    %cst_5 = arith.constant 3.000000e-01 : f32
    %7 = vector.broadcast %cst_5 : f32 to vector<128x512xf32>
    %8 = arith.mulf %7, %6 : vector<128x512xf32>
    %9 = arith.maximumf %6, %8 : vector<128x512xf32>
    %10 = arith.truncf %9 : vector<128x512xf32> to vector<128x512xbf16>
    %c0_6 = arith.constant 0 : index
    %c0_7 = arith.constant 0 : index
    %11 = vector.load %arg4[%c0_6, %c0_7] : memref<512x256xbf16, #tpu.memory_space<vmem>>, vector<512x256xbf16>
    %cst_8 = arith.constant dense<0.000000e+00> : vector<128x256xf32>
    %12 = tpu.matmul %10, %11, %cst_8 {dimension_numbers = #tpu.dot_dimension_numbers<[1], [0], [0], [1], [0, 0, 1, 1], [], []>} : vector<128x512xbf16>, vector<512x256xbf16>, vector<128x256xf32> -> vector<128x256xf32>
    %c0_9 = arith.constant 0 : index
    %c0_10 = arith.constant 0 : index
    %13 = vector.load %arg5[%c0_9, %c0_10] : memref<1x256xf32, #tpu.memory_space<vmem>>, vector<1x256xf32>
    %14 = vector.broadcast %13 : vector<1x256xf32> to vector<128x256xf32>
    %15 = arith.addf %12, %14 : vector<128x256xf32>
    %cst_11 = arith.constant 3.000000e-01 : f32
    %16 = vector.broadcast %cst_11 : f32 to vector<128x256xf32>
    %17 = arith.mulf %16, %15 : vector<128x256xf32>
    %18 = arith.maximumf %15, %17 : vector<128x256xf32>
    %19 = tpu.transpose %18, [1, 0] : vector<128x256xf32> -> vector<256x128xf32>
    %c0_12 = arith.constant 0 : index
    %c0_13 = arith.constant 0 : index
    %20 = vector.load %arg6[%c0_12, %c0_13] : memref<256x1xf32, #tpu.memory_space<vmem>>, vector<256x1xf32>
    %21 = vector.broadcast %20 : vector<256x1xf32> to vector<256x128xf32>
    %22 = arith.mulf %19, %21 : vector<256x128xf32>
    %cst_14 = arith.constant dense<0.000000e+00> : vector<128xf32>
    %23 = vector.multi_reduction <add>, %22, %cst_14 [0] : vector<256x128xf32> to vector<128xf32>
    %24 = vector.shape_cast %23 : vector<128xf32> to vector<1x128xf32>
    %c0_15 = arith.constant 0 : index
    %c0_16 = arith.constant 0 : index
    %25 = vector.load %arg7[%c0_15, %c0_16] : memref<1x1xf32, #tpu.memory_space<vmem>>, vector<1x1xf32>
    %26 = vector.broadcast %25 : vector<1x1xf32> to vector<1x128xf32>
    %27 = arith.addf %24, %26 : vector<1x128xf32>
    %28 = arith.negf %27 : vector<1x128xf32>
    %29 = math.exp %28 : vector<1x128xf32>
    %cst_17 = arith.constant 1.000000e+00 : f32
    %30 = vector.broadcast %cst_17 : f32 to vector<1x128xf32>
    %31 = arith.addf %30, %29 : vector<1x128xf32>
    %32 = arith.divf %30, %31 : vector<1x128xf32>
    %c0_18 = arith.constant 0 : index
    %c0_19 = arith.constant 0 : index
    %33 = vector.load %arg8[%c0_18, %c0_19] : memref<1x128xf32, #tpu.memory_space<vmem>>, vector<1x128xf32>
    tpu.vector_store %arg8[%c0_18, %c0_19], %32 {strides = array<i32>} : memref<1x128xf32, #tpu.memory_space<vmem>>, vector<1x128xf32>,
    return
  }
  func.func @transform_0(%arg0: i32) -> (i32, i32) {
    %c0_i32 = arith.constant 0 : i32
    %c0_i32_0 = arith.constant 0 : i32
    return %arg0, %c0_i32 : i32, i32
  }
  func.func @transform_1(%arg0: i32) -> (i32, i32) {
    %c0_i32 = arith.constant 0 : i32
    %c0_i32_0 = arith.constant 0 : i32
    %c0_i32_1 = arith.constant 0 : i32
    return %c0_i32, %c0_i32_0 : i32, i32
  }
  func.func @transform_2(%arg0: i32) -> (i32, i32) {
    %c0_i32 = arith.constant 0 : i32
    %c0_i32_0 = arith.constant 0 : i32
    %c0_i32_1 = arith.constant 0 : i32
    return %c0_i32, %c0_i32_0 : i32, i32
  }
  func.func @transform_3(%arg0: i32) -> (i32, i32) {
    %c0_i32 = arith.constant 0 : i32
    %c0_i32_0 = arith.constant 0 : i32
    %c0_i32_1 = arith.constant 0 : i32
    return %c0_i32, %c0_i32_0 : i32, i32
  }
  func.func @transform_4(%arg0: i32) -> (i32, i32) {
    %c0_i32 = arith.constant 0 : i32
    %c0_i32_0 = arith.constant 0 : i32
    %c0_i32_1 = arith.constant 0 : i32
    return %c0_i32, %c0_i32_0 : i32, i32
  }
  func.func @transform_5(%arg0: i32) -> (i32, i32) {
    %c0_i32 = arith.constant 0 : i32
    %c0_i32_0 = arith.constant 0 : i32
    %c0_i32_1 = arith.constant 0 : i32
    return %c0_i32, %c0_i32_0 : i32, i32
  }
  func.func @transform_6(%arg0: i32) -> (i32, i32) {
    %c0_i32 = arith.constant 0 : i32
    %c0_i32_0 = arith.constant 0 : i32
    %c0_i32_1 = arith.constant 0 : i32
    return %c0_i32, %c0_i32_0 : i32, i32
  }
  func.func @transform_7(%arg0: i32) -> (i32, i32) {
    %c0_i32 = arith.constant 0 : i32
    %c0_i32_0 = arith.constant 0 : i32
    return %arg0, %c0_i32 : i32, i32
  }
}

</mosaic_0001>

<bundles_post_ra>
// kernel: tpu_custom_call.1
= control target key start
LH: loop header
LB: loop body
LE: loop exit
PB: predicated region body
PF: predicated region fallthrough
CT: control target
= control target key end

     0   :  { %s5714_s0 = inlined_call_operand.vmem [shape: f32[8,784], index: 0, kind: input, shape index: {}]   ;;  %s5715_s1 = inlined_call_operand.hbm [shape: bf16[784,512], index: 1, kind: input, shape index: {}]   ;;  %s5716_s2 = inlined_call_operand.vmem [shape: f32[1,512], index: 2, kind: input, shape index: {}]   ;;  %s5717_s3 = inlined_call_operand.hbm [shape: bf16[512,256], index: 3, kind: input, shape index: {}]   ;;  %s5718_s4 = inlined_call_operand.vmem [shape: f32[1,256], index: 4, kind: input, shape index: {}]   ;;  %s5719_s5 = inlined_call_operand.vmem [shape: f32[256,1], index: 5, kind: input, shape index: {}]   ;;  %s5720_s6 = inlined_call_operand.<no memory space> [shape: f32[1,1], index: 6, kind: input, shape index: {}]   ;;  %s5721_s7 = inlined_call_operand.hbm [shape: f32[1,128], index: 7, kind: output, shape index: {}]  }
   0x1   :  { %v12_v0 = vstv %s5720_s6 }
   0x2   :  { %13 = vst [vmem:[#allocation2] sm:$0x1] %v12_v0 }
   0x3   :  { %14 = vsyncpa [#allocation4], 0 }
   0x4   :  { %15 = vsyncpa [#allocation7], 0 }
   0x5   :  { %16 = vsyncpa [#allocation5], 0  ;;  %s4631_s26 = smov [#allocation3]   ;;  %s4559_s30 = scalar_lea.hbm %s5715_s1, 25088 }
   0x6   :  { %s24_s27 = sshll.u32 %s4631_s26, 4  ;;  %p4560_p0 = scmp.ne.s32.totalorder %s5715_s1, %s4559_s30  ;;  %s25_s27 = int_to_ptr.vmem [resolvable:$true] %s24_s27 }
   0x7   :  { %p4563_p1 = scmp.lt.u32.totalorder %s4559_s30, %s5715_s1 }
   0x9   :  { %p4565_p2 = pnand %p4563_p1, %p4560_p0 }
   0xb   :  { %4568 = shalt.err (!%p4565_p2)
}
   0xc   :  { %s4569_s6 = scalar_lea.vmem %s25_s27, 25088  ;;  %p4574_p4 = scmp.lt.s32.totalorder %s25_s27, %s25_s27 }
   0xd   :  { %p4570_p3 = scmp.ne.s32.totalorder %s25_s27, %s4569_s6  ;;  %p4575_p5 = scmp.lt.s32.totalorder %s4569_s6, %s4569_s6 }
   0xf   :  { %p4576_p6 = por %p4575_p5, %p4574_p4 }
  0x11   :  { %p4577_p7 = pnand %p4576_p6, %p4570_p3 }
  0x13   :  { %4580 = shalt.err (!%p4577_p7)
}
  0x14   :  { %s4632_s12 = smov 256   ;;  %s4633_s13 = smov 16  }
  0x15   :  { %30 = dma.hbm_to_vmem [thread:$0]  %s5715_s1, 25088, %s25_s27, [#allocation4], %s4632_s12, %s4632_s12, %s4633_s13  }
  0x16   :  { %s4634_s16 = smov [#allocation6]   ;;  %s4581_s20 = scalar_lea.hbm %s5717_s3, 8192 }
  0x17   :  { %s38_s17 = sshll.u32 %s4634_s16, 4  ;;  %p4582_p8 = scmp.ne.s32.totalorder %s5717_s3, %s4581_s20  ;;  %s39_s17 = int_to_ptr.vmem [resolvable:$true] %s38_s17 }
  0x18   :  { %p4585_p9 = scmp.lt.u32.totalorder %s4581_s20, %s5717_s3 }
  0x1a   :  { %p4587_p10 = pnand %p4585_p9, %p4582_p8 }
  0x1c   :  { %4590 = shalt.err (!%p4587_p10)
}
  0x1d   :  { %s4591_s25 = scalar_lea.vmem %s39_s17, 8192  ;;  %p4596_p12 = scmp.lt.s32.totalorder %s39_s17, %s39_s17 }
  0x1e   :  { %p4592_p11 = scmp.ne.s32.totalorder %s39_s17, %s4591_s25  ;;  %p4597_p13 = scmp.lt.s32.totalorder %s4591_s25, %s4591_s25 }
  0x20   :  { %p4598_p0 = por %p4597_p13, %p4596_p12 }
  0x22   :  { %p4599_p1 = pnand %p4598_p0, %p4592_p11 }
  0x24   :  { %4602 = shalt.err (!%p4599_p1)
}
  0x25   :  { %s4635_s1 = smov 128   ;;  %s4636_s26 = smov 8  }
  0x26   :  { %44 = dma.hbm_to_vmem [thread:$0]  %s5717_s3, 8192, %s39_s17, [#allocation7], %s4635_s1, %s4635_s1, %s4636_s26  }
  0x27   :  { %4625 = dma.done.wait [#allocation4], 25088  }
  0x28   :  { %4626 = vsyncadd [#allocation4], 4294942208 }
  0x29   :  { %4627 = dma.done.wait [#allocation7], 8192  }
  0x2a   :  { %4628 = vsyncadd [#allocation7], 4294959104  ;;  %v4165_v1 = vld [vmem:[#allocation3 + $0x4] ss:$16 sps:$4 sm:$0xff]   ;;  %v4169_v3 = vld [vmem:[#allocation3] ss:$16 sps:$4 sm:$0xff]  }
  0x2b   :  { %v4167_v2 = vld [vmem:[#allocation3 + $0x204] ss:$16 sps:$4 sm:$0xff]   ;;  %1449 = vmatprep.subr.bf16.mxu1 %v4165_v1  ;;  %v4170_v4 = vld [vmem:[#allocation3 + $0x200] ss:$16 sps:$4 sm:$0xff]   ;;  %vm1424_vm0 = vcmask 130048  }
  0x2c   :  { %1562 = vmatprep.subr.bf16.mxu0 %v4167_v2  ;;  %v4171_v5 = vld [vmem:[#allocation3 + $0x24] ss:$16 sps:$4 sm:$0xff]   ;;  %1450 = vmatpush1.bf16.msra.mxu1 %v4169_v3  ;;  %v4175_v7 = vld [vmem:[#allocation3 + $0x20] ss:$16 sps:$4 sm:$0xff]  }
  0x2d   :  { %1563 = vmatpush1.bf16.msra.mxu0 %v4170_v4  ;;  %v4173_v6 = vld [vmem:[#allocation3 + $0x224] ss:$16 sps:$4 sm:$0xff]   ;;  %1451 = vmatprep.subr.bf16.mxu1 %v4171_v5  ;;  %v4176_v8 = vld [vmem:[#allocation3 + $0x220] ss:$16 sps:$4 sm:$0xff]  }
  0x2e   :  { %1564 = vmatprep.subr.bf16.mxu0 %v4173_v6  ;;  %v4177_v9 = vld [vmem:[#allocation3 + $0x44] ss:$16 sps:$4 sm:$0xff]   ;;  %v4181_v11 = vld [vmem:[#allocation3 + $0x40] ss:$16 sps:$4 sm:$0xff]  }
  0x2f   :  { %v4179_v10 = vld [vmem:[#allocation3 + $0x244] ss:$16 sps:$4 sm:$0xff]   ;;  %v4182_v12 = vld [vmem:[#allocation3 + $0x240] ss:$16 sps:$4 sm:$0xff]  }
  0x30   :  { %1452 = vmatpush1.bf16.msra.mxu1 %v4175_v7  ;;  %v4183_v13 = vld [vmem:[#allocation3 + $0x64] ss:$16 sps:$4 sm:$0xff]   ;;  %v4187_v15 = vld [vmem:[#allocation3 + $0x60] ss:$16 sps:$4 sm:$0xff]  }
  0x31   :  { %1565 = vmatpush1.bf16.msra.mxu0 %v4176_v8  ;;  %1453 = vmatprep.subr.bf16.mxu1 %v4177_v9  ;;  %v4185_v14 = vld [vmem:[#allocation3 + $0x264] ss:$16 sps:$4 sm:$0xff]   ;;  %v4188_v16 = vld [vmem:[#allocation3 + $0x260] ss:$16 sps:$4 sm:$0xff]  }
  0x32   :  { %1566 = vmatprep.subr.bf16.mxu0 %v4179_v10  ;;  %v4189_v17 = vld [vmem:[#allocation3 + $0x84] ss:$16 sps:$4 sm:$0xff]   ;;  %v4193_v19 = vld [vmem:[#allocation3 + $0x80] ss:$16 sps:$4 sm:$0xff]  }
  0x33   :  { %v4191_v18 = vld [vmem:[#allocation3 + $0x284] ss:$16 sps:$4 sm:$0xff]   ;;  %v4194_v20 = vld [vmem:[#allocation3 + $0x280] ss:$16 sps:$4 sm:$0xff]  }
  0x34   :  { %1454 = vmatpush1.bf16.msra.mxu1 %v4181_v11  ;;  %v4195_v21 = vld [vmem:[#allocation3 + $0xa4] ss:$16 sps:$4 sm:$0xff]   ;;  %v4199_v23 = vld [vmem:[#allocation3 + $0xa0] ss:$16 sps:$4 sm:$0xff]  }
  0x35   :  { %1567 = vmatpush1.bf16.msra.mxu0 %v4182_v12  ;;  %1455 = vmatprep.subr.bf16.mxu1 %v4183_v13  ;;  %v4197_v22 = vld [vmem:[#allocation3 + $0x2a4] ss:$16 sps:$4 sm:$0xff]   ;;  %v4200_v24 = vld [vmem:[#allocation3 + $0x2a0] ss:$16 sps:$4 sm:$0xff]   ;;  %v4266_v12 = vld [vmem:[#allocation3 + $0xc] ss:$16 sps:$4 sm:$0xff]  }
  0x36   :  { %1568 = vmatprep.subr.bf16.mxu0 %v4185_v14  ;;  %v4201_v25 = vld [vmem:[#allocation3 + $0xc4] ss:$16 sps:$4 sm:$0xff]   ;;  %v4205_v27 = vld [vmem:[#allocation3 + $0xc0] ss:$16 sps:$4 sm:$0xff]   ;;  %v4264_v14 = vld [vmem:[#allocation3 + $0x8] ss:$16 sps:$4 sm:$0xff]  }
  0x37   :  { %v4203_v26 = vld [vmem:[#allocation3 + $0x2c4] ss:$16 sps:$4 sm:$0xff]   ;;  %v4206_v28 = vld [vmem:[#allocation3 + $0x2c0] ss:$16 sps:$4 sm:$0xff]  }
  0x38   :  { %1456 = vmatpush1.bf16.msra.mxu1 %v4187_v15  ;;  %v4207_v29 = vld [vmem:[#allocation3 + $0xe4] ss:$16 sps:$4 sm:$0xff]   ;;  %v4211_v31 = vld [vmem:[#allocation3 + $0xe0] ss:$16 sps:$4 sm:$0xff]  }
  0x39   :  { %1569 = vmatpush1.bf16.msra.mxu0 %v4188_v16  ;;  %1457 = vmatprep.subr.bf16.mxu1 %v4189_v17  ;;  %v4209_v30 = vld [vmem:[#allocation3 + $0x2e4] ss:$16 sps:$4 sm:$0xff]   ;;  %v4212_v32 = vld [vmem:[#allocation3 + $0x2e0] ss:$16 sps:$4 sm:$0xff]  }
  0x3a   :  { %1570 = vmatprep.subr.bf16.mxu0 %v4191_v18  ;;  %v4213_v33 = vld [vmem:[#allocation3 + $0x104] ss:$16 sps:$4 sm:$0xff]   ;;  %v4217_v35 = vld [vmem:[#allocation3 + $0x100] ss:$16 sps:$4 sm:$0xff]  }
  0x3b   :  { %v4215_v34 = vld [vmem:[#allocation3 + $0x304] ss:$16 sps:$4 sm:$0xff]   ;;  %v4218_v36 = vld [vmem:[#allocation3 + $0x300] ss:$16 sps:$4 sm:$0xff]  }
  0x3c   :  { %1458 = vmatpush1.bf16.msra.mxu1 %v4193_v19  ;;  %v4219_v37 = vld [vmem:[#allocation3 + $0x124] ss:$16 sps:$4 sm:$0xff]   ;;  %v4223_v39 = vld [vmem:[#allocation3 + $0x120] ss:$16 sps:$4 sm:$0xff]  }
  0x3d   :  { %1571 = vmatpush1.bf16.msra.mxu0 %v4194_v20  ;;  %1459 = vmatprep.subr.bf16.mxu1 %v4195_v21  ;;  %v4221_v38 = vld [vmem:[#allocation3 + $0x324] ss:$16 sps:$4 sm:$0xff]   ;;  %v4224_v40 = vld [vmem:[#allocation3 + $0x320] ss:$16 sps:$4 sm:$0xff]  }
  0x3e   :  { %1572 = vmatprep.subr.bf16.mxu0 %v4197_v22  ;;  %v4225_v41 = vld [vmem:[#allocation3 + $0x144] ss:$16 sps:$4 sm:$0xff]   ;;  %v4229_v43 = vld [vmem:[#allocation3 + $0x140] ss:$16 sps:$4 sm:$0xff]   ;;  %v4272_v22 = vld [vmem:[#allocation3 + $0x2c] ss:$16 sps:$4 sm:$0xff]  }
  0x3f   :  { %v4227_v42 = vld [vmem:[#allocation3 + $0x344] ss:$16 sps:$4 sm:$0xff]   ;;  %v4230_v44 = vld [vmem:[#allocation3 + $0x340] ss:$16 sps:$4 sm:$0xff]  }
  0x40   :  { %1460 = vmatpush1.bf16.msra.mxu1 %v4199_v23  ;;  %v4231_v45 = vld [vmem:[#allocation3 + $0x164] ss:$16 sps:$4 sm:$0xff]   ;;  %v4235_v51 = vld [vmem:[#allocation3 + $0x160] ss:$16 sps:$4 sm:$0xff]  }
  0x41   :  { %1573 = vmatpush1.bf16.msra.mxu0 %v4200_v24  ;;  %1461 = vmatprep.subr.bf16.mxu1 %v4201_v25  ;;  %v4233_v46 = vld [vmem:[#allocation3 + $0x364] ss:$16 sps:$4 sm:$0xff]   ;;  %v4236_v52 = vld [vmem:[#allocation3 + $0x360] ss:$16 sps:$4 sm:$0xff]  }
  0x42   :  { %1574 = vmatprep.subr.bf16.mxu0 %v4203_v26  ;;  %v59_v47 = vld [vmem:[%s5714_s0 + $0x8] sm:$0xff]  ;;  %v66_v48 = vld [vmem:[%s5714_s0 + $0x40] sm:$0xff]  ;;  %v61_v49 = vld [vmem:[%s5714_s0 + $0x18] sm:$0xff]  ;;  %v4637_v26 = vmov 0  }
  0x43   :  { %v68_v50 = vld [vmem:[%s5714_s0 + $0x50] sm:$0xff]  ;;  %v4718_v54 = vpack.c.bf16 %v66_v48, %v59_v47  ;;  %v58_v7 = vld [vmem:[%s5714_s0] sm:$0xff]  ;;  %v65_v8 = vld [vmem:[%s5714_s0 + $0x38] sm:$0xff]  ;;  %4164 = vset.pattern.permute.xlu1 %v4637_v26  ;;  %4163 = vset.pattern.permute.xlu0 %v4637_v26 }
  0x44   :  { %1462 = vmatpush1.bf16.msra.mxu1 %v4205_v27  ;;  %v4237_v53 = vld [vmem:[#allocation3 + $0x184] ss:$16 sps:$4 sm:$0xff]   ;;  %v4720_v55 = vpack.c.bf16 %v68_v50, %v61_v49  ;;  %v4241_v57 = vld [vmem:[#allocation3 + $0x180] ss:$16 sps:$4 sm:$0xff]   ;;  %v4742_v17 = vpack.c.bf16 %v65_v8, %v58_v7  ;;  %v4270_v27 = vld [vmem:[#allocation3 + $0x28] ss:$16 sps:$4 sm:$0xff]  }
  0x45   :  { %1575 = vmatpush1.bf16.msra.mxu0 %v4206_v28  ;;  %1463 = vmatprep.subr.bf16.mxu1 %v4207_v29  ;;  %v4239_v56 = vld [vmem:[#allocation3 + $0x384] ss:$16 sps:$4 sm:$0xff]   ;;  %v4242_v58 = vld [vmem:[#allocation3 + $0x380] ss:$16 sps:$4 sm:$0xff]   ;;  %v4282_v47 = vld [vmem:[#allocation3 + $0x68] ss:$16 sps:$4 sm:$0xff]  }
  0x46   :  { %1576 = vmatprep.subr.bf16.mxu0 %v4209_v30  ;;  %1481 = vmatprep.mubr.bf16.mxu1 %v4718_v54  ;;  %v4243_v59 = vld [vmem:[#allocation3 + $0x1a4] ss:$16 sps:$4 sm:$0xff]   ;;  %v4247_v61 = vld [vmem:[#allocation3 + $0x1a0] ss:$16 sps:$4 sm:$0xff]  }
  0x47   :  { %1594 = vmatprep.mubr.bf16.mxu0 %v4720_v55  ;;  %v4245_v60 = vld [vmem:[#allocation3 + $0x3a4] ss:$16 sps:$4 sm:$0xff]   ;;  %v4248_v62 = vld [vmem:[#allocation3 + $0x3a0] ss:$16 sps:$4 sm:$0xff]  }
  0x48   :  { %1464 = vmatpush1.bf16.msra.mxu1 %v4211_v31  ;;  %v4249_v63 = vld [vmem:[#allocation3 + $0x1c4] ss:$16 sps:$4 sm:$0xff]   ;;  %v4253_v1 = vld [vmem:[#allocation3 + $0x1c0] ss:$16 sps:$4 sm:$0xff]  }
  0x49   :  { %1577 = vmatpush1.bf16.msra.mxu0 %v4212_v32  ;;  %1465 = vmatprep.subr.bf16.mxu1 %v4213_v33  ;;  %v4251_v0 = vld [vmem:[#allocation3 + $0x3c4] ss:$16 sps:$4 sm:$0xff]   ;;  %v4254_v2 = vld [vmem:[#allocation3 + $0x3c0] ss:$16 sps:$4 sm:$0xff]   ;;  %v4278_v33 = vld [vmem:[#allocation3 + $0x4c] ss:$16 sps:$4 sm:$0xff]  }
  0x4a   :  { %1578 = vmatprep.subr.bf16.mxu0 %v4215_v34  ;;  %v4255_v3 = vld [vmem:[#allocation3 + $0x1e4] ss:$16 sps:$4 sm:$0xff]   ;;  %v4259_v5 = vld [vmem:[#allocation3 + $0x1e0] ss:$16 sps:$4 sm:$0xff]  }
  0x4b   :  { %v4257_v4 = vld [vmem:[#allocation3 + $0x3e4] ss:$16 sps:$4 sm:$0xff]   ;;  %v4260_v6 = vld [vmem:[#allocation3 + $0x3e0] ss:$16 sps:$4 sm:$0xff]  }
  0x4c   :  { %1466 = vmatpush1.bf16.msra.mxu1 %v4217_v35  ;;  %v60_v9 = vld [vmem:[%s5714_s0 + $0x10] sm:$0xff]  ;;  %v67_v10 = vld [vmem:[%s5714_s0 + $0x48] sm:$0xff]  ;;  %v73_v15 = vld [vmem:[%s5714_s0 + $0x78] sm:$0xff] }
  0x4d   :  { %1579 = vmatpush1.bf16.msra.mxu0 %v4218_v36  ;;  %1467 = vmatprep.subr.bf16.mxu1 %v4219_v37  ;;  %v4263_v11 = vld [vmem:[#allocation3 + $0x404] ss:$16 sps:$4 sm:$0xff]   ;;  %v4261_v13 = vld [vmem:[#allocation3 + $0x400] ss:$16 sps:$4 sm:$0xff]   ;;  %v4744_v18 = vpack.c.bf16 %v67_v10, %v60_v9  ;;  %v4276_v35 = vld [vmem:[#allocation3 + $0x48] ss:$16 sps:$4 sm:$0xff]  }
  0x4e   :  { %1580 = vmatprep.subr.bf16.mxu0 %v4221_v38  ;;  %v80_v16 = vld [vmem:[%s5714_s0 + $0xb0] sm:$0xff]  ;;  %v75_v19 = vld [vmem:[%s5714_s0 + $0x88] sm:$0xff]  ;;  %v82_v20 = vld [vmem:[%s5714_s0 + $0xc0] sm:$0xff] }
  0x4f   :  { %v4269_v21 = vld [vmem:[#allocation3 + $0x424] ss:$16 sps:$4 sm:$0xff]   ;;  %v4267_v23 = vld [vmem:[#allocation3 + $0x420] ss:$16 sps:$4 sm:$0xff]   ;;  %v4752_v24 = vpack.c.bf16 %v80_v16, %v73_v15  ;;  %v4754_v25 = vpack.c.bf16 %v82_v20, %v75_v19 }
  0x50   :  { %1468 = vmatpush1.bf16.msra.mxu1 %v4223_v39  ;;  %v72_v28 = vld [vmem:[%s5714_s0 + $0x70] sm:$0xff]  ;;  %v79_v29 = vld [vmem:[%s5714_s0 + $0xa8] sm:$0xff]  ;;  %v74_v30 = vld [vmem:[%s5714_s0 + $0x80] sm:$0xff] }
  0x51   :  { %1581 = vmatpush1.bf16.msra.mxu0 %v4224_v40  ;;  %1469 = vmatprep.subr.bf16.mxu1 %v4225_v41  ;;  %v81_v31 = vld [vmem:[%s5714_s0 + $0xb8] sm:$0xff]  ;;  %v4273_v34 = vld [vmem:[#allocation3 + $0x440] ss:$16 sps:$4 sm:$0xff]   ;;  %v87_v36 = vld [vmem:[%s5714_s0 + $0xe8] sm:$0xff]  ;;  %v4780_v38 = vpack.c.bf16 %v79_v29, %v72_v28 }
  0x52   :  { %1582 = vmatprep.subr.bf16.mxu0 %v4227_v42  ;;  %v4275_v32 = vld [vmem:[#allocation3 + $0x444] ss:$16 sps:$4 sm:$0xff]   ;;  %v4782_v39 = vpack.c.bf16 %v81_v31, %v74_v30  ;;  %v4306_v30 = vld [vmem:[#allocation3 + $0xe8] ss:$16 sps:$4 sm:$0xff]  }
  0x53   :  { %v94_v37 = vld [vmem:[%s5714_s0 + $0x120] sm:$0xff]  ;;  %v89_v40 = vld [vmem:[%s5714_s0 + $0xf8] sm:$0xff]  ;;  %v96_v41 = vld [vmem:[%s5714_s0 + $0x130] sm:$0xff] }
  0x54   :  { %1470 = vmatpush1.bf16.msra.mxu1 %v4229_v43  ;;  %v4281_v42 = vld [vmem:[#allocation3 + $0x464] ss:$16 sps:$4 sm:$0xff]   ;;  %v4284_v43 = vld [vmem:[#allocation3 + $0x6c] ss:$16 sps:$4 sm:$0xff]  }
  0x55   :  { %1583 = vmatpush1.bf16.msra.mxu0 %v4230_v44  ;;  %1471 = vmatprep.subr.bf16.mxu1 %v4231_v45  ;;  %v4279_v44 = vld [vmem:[#allocation3 + $0x460] ss:$16 sps:$4 sm:$0xff]   ;;  %v4790_v45 = vpack.c.bf16 %v94_v37, %v87_v36  ;;  %v93_v49 = vld [vmem:[%s5714_s0 + $0x118] sm:$0xff]  ;;  %v107_v7 = vld [vmem:[%s5714_s0 + $0x188] sm:$0xff] }
  0x56   :  { %1584 = vmatprep.subr.bf16.mxu0 %v4233_v46  ;;  %v4792_v46 = vpack.c.bf16 %v96_v41, %v89_v40  ;;  %v86_v48 = vld [vmem:[%s5714_s0 + $0xe0] sm:$0xff]  ;;  %v88_v50 = vld [vmem:[%s5714_s0 + $0xf0] sm:$0xff]  ;;  %v109_v9 = vld [vmem:[%s5714_s0 + $0x198] sm:$0xff] }
  0x57   :  { %v102_v8 = vld [vmem:[%s5714_s0 + $0x160] sm:$0xff]  ;;  %v117_v20 = vld [vmem:[%s5714_s0 + $0x1d8] sm:$0xff] }
  0x58   :  { %1472 = vmatpush1.bf16.msra.mxu1 %v4235_v51  ;;  %v95_v51 = vld [vmem:[%s5714_s0 + $0x128] sm:$0xff]  ;;  %v122_v15 = vld [vmem:[%s5714_s0 + $0x200] sm:$0xff]  ;;  %v4854_v19 = vpack.c.bf16 %v109_v9, %v102_v8  ;;  %v129_v41 = vld [vmem:[%s5714_s0 + $0x238] sm:$0xff] }
  0x59   :  { %1585 = vmatpush1.bf16.msra.mxu0 %v4236_v52  ;;  %1473 = vmatprep.subr.bf16.mxu1 %v4237_v53  ;;  %v4287_v52 = vld [vmem:[#allocation3 + $0x484] ss:$16 sps:$4 sm:$0xff]   ;;  %v4290_v53 = vld [vmem:[#allocation3 + $0x8c] ss:$16 sps:$4 sm:$0xff]   ;;  %v4309_v37 = vld [vmem:[#allocation3 + $0x500] ss:$16 sps:$4 sm:$0xff]  }
  0x5a   :  { %1586 = vmatprep.subr.bf16.mxu0 %v4239_v56  ;;  %v4285_v56 = vld [vmem:[#allocation3 + $0x480] ss:$16 sps:$4 sm:$0xff]   ;;  %v4299_v10 = vld [vmem:[#allocation3 + $0x4c4] ss:$16 sps:$4 sm:$0xff]   ;;  %v4314_v36 = vld [vmem:[#allocation3 + $0x10c] ss:$16 sps:$4 sm:$0xff]  }
  0x5b   :  { %v114_v31 = vld [vmem:[%s5714_s0 + $0x1c0] sm:$0xff]  ;;  %v4312_v40 = vld [vmem:[#allocation3 + $0x108] ss:$16 sps:$4 sm:$0xff]  }
  0x5c   :  { %1474 = vmatpush1.bf16.msra.mxu1 %v4241_v57  ;;  %v4288_v57 = vld [vmem:[#allocation3 + $0x88] ss:$16 sps:$4 sm:$0xff]  }
  0x5d   :  { %1587 = vmatpush1.bf16.msra.mxu0 %v4242_v58  ;;  %1475 = vmatprep.subr.bf16.mxu1 %v4243_v59  ;;  %v101_v58 = vld [vmem:[%s5714_s0 + $0x158] sm:$0xff]  ;;  %v108_v59 = vld [vmem:[%s5714_s0 + $0x190] sm:$0xff] }
  0x5e   :  { %1588 = vmatprep.subr.bf16.mxu0 %v4245_v60  ;;  %v4816_v60 = vpack.c.bf16 %v93_v49, %v86_v48  ;;  %v138_v48 = vld [vmem:[%s5714_s0 + $0x280] sm:$0xff]  ;;  %v145_v9 = vld [vmem:[%s5714_s0 + $0x2b8] sm:$0xff] }
  0x5f   :  { %v4317_v49 = vld [vmem:[#allocation3 + $0x524] ss:$16 sps:$4 sm:$0xff]  }
  0x60   :  { %1476 = vmatpush1.bf16.msra.mxu1 %v4247_v61  ;;  %v4818_v61 = vpack.c.bf16 %v95_v51, %v88_v50  ;;  %v4320_v50 = vld [vmem:[#allocation3 + $0x12c] ss:$16 sps:$4 sm:$0xff]   ;;  %v4315_v51 = vld [vmem:[#allocation3 + $0x520] ss:$16 sps:$4 sm:$0xff]  }
  0x61   :  { %1589 = vmatpush1.bf16.msra.mxu0 %v4248_v62  ;;  %1477 = vmatprep.subr.bf16.mxu1 %v4249_v63  ;;  %v103_v62 = vld [vmem:[%s5714_s0 + $0x168] sm:$0xff]  ;;  %v110_v63 = vld [vmem:[%s5714_s0 + $0x1a0] sm:$0xff] }
  0x62   :  { %1590 = vmatprep.subr.bf16.mxu0 %v4251_v0  ;;  %v4293_v0 = vld [vmem:[#allocation3 + $0x4a4] ss:$16 sps:$4 sm:$0xff]  }
  0x64   :  { %1478 = vmatpush1.bf16.msra.mxu1 %v4253_v1  ;;  %v4296_v1 = vld [vmem:[#allocation3 + $0xac] ss:$16 sps:$4 sm:$0xff]  }
  0x65   :  { %1591 = vmatpush1.bf16.msra.mxu0 %v4254_v2  ;;  %1479 = vmatprep.subr.bf16.mxu1 %v4255_v3  ;;  %v4291_v2 = vld [vmem:[#allocation3 + $0x4a0] ss:$16 sps:$4 sm:$0xff]   ;;  %v4826_v3 = vpack.c.bf16 %v108_v59, %v101_v58  ;;  %v135_v58 = vld [vmem:[%s5714_s0 + $0x268] sm:$0xff] }
  0x66   :  { %1592 = vmatprep.subr.bf16.mxu0 %v4257_v4  ;;  %v4828_v4 = vpack.c.bf16 %v110_v63, %v103_v62  ;;  %v130_v59 = vld [vmem:[%s5714_s0 + $0x240] sm:$0xff]  ;;  %v137_v62 = vld [vmem:[%s5714_s0 + $0x278] sm:$0xff] }
  0x67   :  { %v4323_v63 = vld [vmem:[#allocation3 + $0x544] ss:$16 sps:$4 sm:$0xff]   ;;  %v4926_v8 = vpack.c.bf16 %v137_v62, %v130_v59 }
  0x68   :  { %1480 = vmatpush1.bf16.msra.mxu1 %v4259_v5  ;;  %v4294_v5 = vld [vmem:[#allocation3 + $0xa8] ss:$16 sps:$4 sm:$0xff]   ;;  %v4347_v62 = vld [vmem:[#allocation3 + $0x5c4] ss:$16 sps:$4 sm:$0xff]  }
  0x69   :  { %1593 = vmatpush1.bf16.msra.mxu0 %v4260_v6  ;;  %1901 = vmatprep.subr.bf16.mxu1 %v4266_v12  ;;  %v100_v6 = vld [vmem:[%s5714_s0 + $0x150] sm:$0xff]  ;;  %v165_v59 = vld [vmem:[%s5714_s0 + $0x358] sm:$0xff] }
  0x6a   :  { %1675 = vmatprep.subr.bf16.mxu0 %v4263_v11  ;;  %v4302_v11 = vld [vmem:[#allocation3 + $0xcc] ss:$16 sps:$4 sm:$0xff]   ;;  %v4297_v12 = vld [vmem:[#allocation3 + $0x4c0] ss:$16 sps:$4 sm:$0xff]   ;;  %v4852_v16 = vpack.c.bf16 %v107_v7, %v100_v6 }
  0x6b   :  { %1482 = vmatmul.mubr.bf16.vlgmr.msra.gmra.mrb[0].mxu1 %v4742_v17  ;;  %v150_v6 = vld [vmem:[%s5714_s0 + $0x2e0] sm:$0xff] }
  0x6c   :  { %1595 = vmatmul.mubr.bf16.vlgmr.msra.gmra.mrb[0].mxu0 %v4744_v18  ;;  %1902 = vmatpush1.bf16.msra.mxu1 %v4264_v14  ;;  %v115_v14 = vld [vmem:[%s5714_s0 + $0x1c8] sm:$0xff] }
  0x6d   :  { %1676 = vmatpush1.bf16.msra.mxu0 %v4261_v13  ;;  %1903 = vmatprep.subr.bf16.mxu1 %v4272_v22  ;;  %v4300_v13 = vld [vmem:[#allocation3 + $0xc8] ss:$16 sps:$4 sm:$0xff]   ;;  %v4305_v22 = vld [vmem:[#allocation3 + $0x4e4] ss:$16 sps:$4 sm:$0xff]   ;;  %v4862_v28 = vpack.c.bf16 %v122_v15, %v115_v14 }
  0x6e   :  { %1677 = vmatprep.subr.bf16.mxu0 %v4269_v21  ;;  %1491 = vmatprep.mubr.bf16.mxu1 %v4752_v24  ;;  %v124_v21 = vld [vmem:[%s5714_s0 + $0x210] sm:$0xff]  ;;  %v4330_v14 = vld [vmem:[#allocation3 + $0x168] ss:$16 sps:$4 sm:$0xff]  }
  0x6f   :  { %1604 = vmatprep.mubr.bf16.mxu0 %v4754_v25  ;;  %v4864_v29 = vpack.c.bf16 %v124_v21, %v117_v20  ;;  %v142_v21 = vld [vmem:[%s5714_s0 + $0x2a0] sm:$0xff] }
  0x70   :  { %1904 = vmatpush1.bf16.msra.mxu1 %v4270_v27  ;;  %v4303_v27 = vld [vmem:[#allocation3 + $0x4e0] ss:$16 sps:$4 sm:$0xff]  }
  0x71   :  { %1678 = vmatpush1.bf16.msra.mxu0 %v4267_v23  ;;  %1905 = vmatprep.subr.bf16.mxu1 %v4278_v33  ;;  %v4308_v23 = vld [vmem:[#allocation3 + $0xec] ss:$16 sps:$4 sm:$0xff]  }
  0x72   :  { %1679 = vmatprep.subr.bf16.mxu0 %v4275_v32  ;;  %v121_v32 = vld [vmem:[%s5714_s0 + $0x1f8] sm:$0xff]  ;;  %v116_v33 = vld [vmem:[%s5714_s0 + $0x1d0] sm:$0xff] }
  0x73   :  { %1492 = vmatmul.mubr.bf16.gmra.mrb[4].mxu1 %v4780_v38 }
  0x74   :  { %1605 = vmatmul.mubr.bf16.gmra.mrb[4].mxu0 %v4782_v39  ;;  %1906 = vmatpush1.bf16.msra.mxu1 %v4276_v35  ;;  %v4311_v35 = vld [vmem:[#allocation3 + $0x504] ss:$16 sps:$4 sm:$0xff]  }
  0x75   :  { %1680 = vmatpush1.bf16.msra.mxu0 %v4273_v34  ;;  %1907 = vmatprep.subr.bf16.mxu1 %v4284_v43  ;;  %v123_v34 = vld [vmem:[%s5714_s0 + $0x208] sm:$0xff]  ;;  %v4888_v43 = vpack.c.bf16 %v121_v32, %v114_v31  ;;  %v4333_v32 = vld [vmem:[#allocation3 + $0x580] ss:$16 sps:$4 sm:$0xff]  }
  0x76   :  { %1681 = vmatprep.subr.bf16.mxu0 %v4281_v42  ;;  %1501 = vmatprep.mubr.bf16.mxu1 %v4790_v45  ;;  %v136_v42 = vld [vmem:[%s5714_s0 + $0x270] sm:$0xff] }
  0x77   :  { %1614 = vmatprep.mubr.bf16.mxu0 %v4792_v46  ;;  %v4338_v31 = vld [vmem:[#allocation3 + $0x18c] ss:$16 sps:$4 sm:$0xff]  }
  0x78   :  { %1908 = vmatpush1.bf16.msra.mxu1 %v4282_v47  ;;  %v131_v47 = vld [vmem:[%s5714_s0 + $0x248] sm:$0xff] }
  0x79   :  { %1682 = vmatpush1.bf16.msra.mxu0 %v4279_v44  ;;  %1909 = vmatprep.subr.bf16.mxu1 %v4290_v53  ;;  %v4890_v44 = vpack.c.bf16 %v123_v34, %v116_v33  ;;  %v4900_v53 = vpack.c.bf16 %v138_v48, %v131_v47  ;;  %v4336_v33 = vld [vmem:[#allocation3 + $0x188] ss:$16 sps:$4 sm:$0xff]   ;;  %v4344_v47 = vld [vmem:[#allocation3 + $0x1ac] ss:$16 sps:$4 sm:$0xff]   ;;  %v4339_v48 = vld [vmem:[#allocation3 + $0x5a0] ss:$16 sps:$4 sm:$0xff]  }
  0x7a   :  { %1683 = vmatprep.subr.bf16.mxu0 %v4287_v52  ;;  %v4898_v52 = vpack.c.bf16 %v136_v42, %v129_v41  ;;  %v157_v34 = vld [vmem:[%s5714_s0 + $0x318] sm:$0xff]  ;;  %v166_v41 = vld [vmem:[%s5714_s0 + $0x360] sm:$0xff] }
  0x7b   :  { %1502 = vmatmul.mubr.bf16.gmra.mrb[8].mxu1 %v4816_v60  ;;  %v4341_v42 = vld [vmem:[#allocation3 + $0x5a4] ss:$16 sps:$4 sm:$0xff]  }
  0x7c   :  { %1615 = vmatmul.mubr.bf16.gmra.mrb[8].mxu0 %v4818_v61  ;;  %1910 = vmatpush1.bf16.msra.mxu1 %v4288_v57  ;;  %v128_v57 = vld [vmem:[%s5714_s0 + $0x230] sm:$0xff] }
  0x7d   :  { %1684 = vmatpush1.bf16.msra.mxu0 %v4285_v56  ;;  %1911 = vmatprep.subr.bf16.mxu1 %v4296_v1  ;;  %v4318_v56 = vld [vmem:[#allocation3 + $0x128] ss:$16 sps:$4 sm:$0xff]   ;;  %v4321_v1 = vld [vmem:[#allocation3 + $0x540] ss:$16 sps:$4 sm:$0xff]   ;;  %v4924_v7 = vpack.c.bf16 %v135_v58, %v128_v57 }
  0x7e   :  { %1685 = vmatprep.subr.bf16.mxu0 %v4293_v0  ;;  %1511 = vmatprep.mubr.bf16.mxu1 %v4826_v3  ;;  %v4326_v0 = vld [vmem:[#allocation3 + $0x14c] ss:$16 sps:$4 sm:$0xff]  }
  0x7f   :  { %1624 = vmatprep.mubr.bf16.mxu0 %v4828_v4  ;;  %v163_v57 = vld [vmem:[%s5714_s0 + $0x348] sm:$0xff]  ;;  %v158_v58 = vld [vmem:[%s5714_s0 + $0x320] sm:$0xff] }
  0x80   :  { %1912 = vmatpush1.bf16.msra.mxu1 %v4294_v5  ;;  %v143_v5 = vld [vmem:[%s5714_s0 + $0x2a8] sm:$0xff] }
  0x81   :  { %1686 = vmatpush1.bf16.msra.mxu0 %v4291_v2  ;;  %1913 = vmatprep.subr.bf16.mxu1 %v4302_v11  ;;  %v4324_v2 = vld [vmem:[#allocation3 + $0x148] ss:$16 sps:$4 sm:$0xff]   ;;  %v4329_v11 = vld [vmem:[#allocation3 + $0x564] ss:$16 sps:$4 sm:$0xff]   ;;  %v4934_v15 = vpack.c.bf16 %v150_v6, %v143_v5 }
  0x82   :  { %1687 = vmatprep.subr.bf16.mxu0 %v4299_v10  ;;  %v152_v10 = vld [vmem:[%s5714_s0 + $0x2f0] sm:$0xff]  ;;  %v4348_v5 = vld [vmem:[#allocation3 + $0x1c8] ss:$16 sps:$4 sm:$0xff]  }
  0x83   :  { %1512 = vmatmul.mubr.bf16.gmra.mrb[12].mxu1 %v4852_v16  ;;  %v4936_v20 = vpack.c.bf16 %v152_v10, %v145_v9  ;;  %v63_v6 = vld [vmem:[%s5714_s0 + $0x28] sm:$0xff]  ;;  %v70_v9 = vld [vmem:[%s5714_s0 + $0x60] sm:$0xff] }
  0x84   :  { %1625 = vmatmul.mubr.bf16.gmra.mrb[12].mxu0 %v4854_v19  ;;  %1914 = vmatpush1.bf16.msra.mxu1 %v4300_v13  ;;  %v4327_v13 = vld [vmem:[#allocation3 + $0x560] ss:$16 sps:$4 sm:$0xff]   ;;  %v4353_v10 = vld [vmem:[#allocation3 + $0x5e4] ss:$16 sps:$4 sm:$0xff]  }
  0x85   :  { %1688 = vmatpush1.bf16.msra.mxu0 %v4297_v12  ;;  %1915 = vmatprep.subr.bf16.mxu1 %v4308_v23  ;;  %v4332_v12 = vld [vmem:[#allocation3 + $0x16c] ss:$16 sps:$4 sm:$0xff]  }
  0x86   :  { %1689 = vmatprep.subr.bf16.mxu0 %v4305_v22  ;;  %1521 = vmatprep.mubr.bf16.mxu1 %v4862_v28  ;;  %v149_v22 = vld [vmem:[%s5714_s0 + $0x2d8] sm:$0xff]  ;;  %v144_v23 = vld [vmem:[%s5714_s0 + $0x2b0] sm:$0xff] }
  0x87   :  { %1634 = vmatprep.mubr.bf16.mxu0 %v4864_v29 }
  0x88   :  { %1916 = vmatpush1.bf16.msra.mxu1 %v4306_v30  ;;  %v4335_v30 = vld [vmem:[#allocation3 + $0x584] ss:$16 sps:$4 sm:$0xff]  }
  0x89   :  { %1690 = vmatpush1.bf16.msra.mxu0 %v4303_v27  ;;  %1917 = vmatprep.subr.bf16.mxu1 %v4314_v36  ;;  %v151_v27 = vld [vmem:[%s5714_s0 + $0x2e8] sm:$0xff] }
  0x8a   :  { %1691 = vmatprep.subr.bf16.mxu0 %v4311_v35  ;;  %v4957_v35 = vpack.c.bf16 %v149_v22, %v142_v21  ;;  %v4959_v36 = vpack.c.bf16 %v151_v27, %v144_v23  ;;  %v62_v21 = vld [vmem:[%s5714_s0 + $0x20] sm:$0xff]  ;;  %v69_v22 = vld [vmem:[%s5714_s0 + $0x58] sm:$0xff] }
  0x8b   :  { %1522 = vmatmul.mubr.bf16.gmra.mrb[16].mxu1 %v4888_v43  ;;  %v4359_v23 = vld [vmem:[#allocation3 + $0x20c] ss:$16 sps:$4 sm:$0xff]  }
  0x8c   :  { %1635 = vmatmul.mubr.bf16.gmra.mrb[16].mxu0 %v4890_v44  ;;  %1918 = vmatpush1.bf16.msra.mxu1 %v4312_v40  ;;  %v159_v40 = vld [vmem:[%s5714_s0 + $0x328] sm:$0xff]  ;;  %v77_v27 = vld [vmem:[%s5714_s0 + $0x98] sm:$0xff] }
  0x8d   :  { %1692 = vmatpush1.bf16.msra.mxu0 %v4309_v37  ;;  %1919 = vmatprep.subr.bf16.mxu1 %v4320_v50  ;;  %v164_v37 = vld [vmem:[%s5714_s0 + $0x350] sm:$0xff] }
  0x8e   :  { %1693 = vmatprep.subr.bf16.mxu0 %v4317_v49  ;;  %1531 = vmatprep.mubr.bf16.mxu1 %v4898_v52  ;;  %v4342_v49 = vld [vmem:[#allocation3 + $0x1a8] ss:$16 sps:$4 sm:$0xff]   ;;  %v4970_v50 = vpack.c.bf16 %v164_v37, %v157_v34  ;;  %v4362_v34 = vld [vmem:[#allocation3 + $0x22c] ss:$16 sps:$4 sm:$0xff]  }
  0x8f   :  { %1644 = vmatprep.mubr.bf16.mxu0 %v4900_v53  ;;  %v4360_v37 = vld [vmem:[#allocation3 + $0x228] ss:$16 sps:$4 sm:$0xff]  }
  0x90   :  { %1920 = vmatpush1.bf16.msra.mxu1 %v4318_v56  ;;  %v156_v56 = vld [vmem:[%s5714_s0 + $0x310] sm:$0xff] }
  0x91   :  { %1694 = vmatpush1.bf16.msra.mxu0 %v4315_v51  ;;  %1921 = vmatprep.subr.bf16.mxu1 %v4326_v0  ;;  %v4972_v51 = vpack.c.bf16 %v166_v41, %v159_v40  ;;  %v4345_v0 = vld [vmem:[#allocation3 + $0x5c0] ss:$16 sps:$4 sm:$0xff]   ;;  %v4365_v41 = vld [vmem:[#allocation3 + $0x24c] ss:$16 sps:$4 sm:$0xff]  }
  0x92   :  { %1695 = vmatprep.subr.bf16.mxu0 %v4323_v63  ;;  %v4350_v63 = vld [vmem:[#allocation3 + $0x1cc] ss:$16 sps:$4 sm:$0xff]  }
  0x93   :  { %1532 = vmatmul.mubr.bf16.gmra.mrb[20].mxu1 %v4924_v7  ;;  %v76_v40 = vld [vmem:[%s5714_s0 + $0x90] sm:$0xff] }
  0x94   :  { %1645 = vmatmul.mubr.bf16.gmra.mrb[20].mxu0 %v4926_v8  ;;  %1922 = vmatpush1.bf16.msra.mxu1 %v4324_v2  ;;  %v4992_v2 = vpack.c.bf16 %v165_v59, %v158_v58  ;;  %v4404_v58 = vld [vmem:[#allocation3 + $0x604] ss:$16 sps:$4 sm:$0xff]   ;;  %v4402_v59 = vld [vmem:[#allocation3 + $0x600] ss:$16 sps:$4 sm:$0xff]  }
  0x95   :  { %1696 = vmatpush1.bf16.msra.mxu0 %v4321_v1  ;;  %1923 = vmatprep.subr.bf16.mxu1 %v4332_v12  ;;  %v4990_v1 = vpack.c.bf16 %v163_v57, %v156_v56  ;;  %v4351_v12 = vld [vmem:[#allocation3 + $0x5e0] ss:$16 sps:$4 sm:$0xff]   ;;  %v4368_v56 = vld [vmem:[#allocation3 + $0x26c] ss:$16 sps:$4 sm:$0xff]   ;;  %v4366_v57 = vld [vmem:[#allocation3 + $0x268] ss:$16 sps:$4 sm:$0xff]  }
  0x96   :  { %1697 = vmatprep.subr.bf16.mxu0 %v4329_v11  ;;  %1541 = vmatprep.mubr.bf16.mxu1 %v4934_v15  ;;  %v4356_v11 = vld [vmem:[#allocation3 + $0x1ec] ss:$16 sps:$4 sm:$0xff]  }
  0x97   :  { %1654 = vmatprep.mubr.bf16.mxu0 %v4936_v20 }
  0x98   :  { %1924 = vmatpush1.bf16.msra.mxu1 %v4330_v14  ;;  %v5000_v14 = vpack.c.bf16 %v70_v9, %v63_v6  ;;  %v4369_v6 = vld [vmem:[#allocation3 + $0x288] ss:$16 sps:$4 sm:$0xff]  }
  0x99   :  { %1698 = vmatpush1.bf16.msra.mxu0 %v4327_v13  ;;  %1925 = vmatprep.subr.bf16.mxu1 %v4338_v31  ;;  %v4354_v13 = vld [vmem:[#allocation3 + $0x1e8] ss:$16 sps:$4 sm:$0xff]   ;;  %v5018_v31 = vpack.c.bf16 %v69_v22, %v62_v21 }
  0x9a   :  { %1699 = vmatprep.subr.bf16.mxu0 %v4335_v30  ;;  %v84_v30 = vld [vmem:[%s5714_s0 + $0xd0] sm:$0xff]  ;;  %v119_v21 = vld [vmem:[%s5714_s0 + $0x1e8] sm:$0xff] }
  0x9b   :  { %1542 = vmatmul.mubr.bf16.gmra.mrb[24].mxu1 %v4957_v35 }
  0x9c   :  { %1655 = vmatmul.mubr.bf16.gmra.mrb[24].mxu0 %v4959_v36  ;;  %1926 = vmatpush1.bf16.msra.mxu1 %v4336_v33  ;;  %v5020_v33 = vpack.c.bf16 %v84_v30, %v77_v27  ;;  %v4380_v30 = vld [vmem:[#allocation3 + $0x2ec] ss:$16 sps:$4 sm:$0xff]  }
  0x9d   :  { %1700 = vmatpush1.bf16.msra.mxu0 %v4333_v32  ;;  %1927 = vmatprep.subr.bf16.mxu1 %v4344_v47  ;;  %v4357_v32 = vld [vmem:[#allocation3 + $0x208] ss:$16 sps:$4 sm:$0xff]  }
  0x9e   :  { %1701 = vmatprep.subr.bf16.mxu0 %v4341_v42  ;;  %1551 = vmatprep.mubr.bf16.mxu1 %v4970_v50  ;;  %v91_v42 = vld [vmem:[%s5714_s0 + $0x108] sm:$0xff] }
  0x9f   :  { %1664 = vmatprep.mubr.bf16.mxu0 %v4972_v51 }
  0xa0   :  { %1928 = vmatpush1.bf16.msra.mxu1 %v4342_v49 }
  0xa1   :  { %1702 = vmatpush1.bf16.msra.mxu0 %v4339_v48  ;;  %1929 = vmatprep.subr.bf16.mxu1 %v4350_v63  ;;  %v4363_v48 = vld [vmem:[#allocation3 + $0x248] ss:$16 sps:$4 sm:$0xff]   ;;  %v4371_v63 = vld [vmem:[#allocation3 + $0x28c] ss:$16 sps:$4 sm:$0xff]  }
  0xa2   :  { %1703 = vmatprep.subr.bf16.mxu0 %v4347_v62  ;;  %v97_v62 = vld [vmem:[%s5714_s0 + $0x138] sm:$0xff] }
  0xa3   :  { %1552 = vmatmul.mubr.bf16.gmra.mrb[28].mxu1 %v4990_v1 }
  0xa4   :  { %1665 = vmatmul.mubr.bf16.gmra.mrb[28].mxu0 %v4992_v2  ;;  %1930 = vmatpush1.bf16.msra.mxu1 %v4348_v5 }
  0xa5   :  { %1704 = vmatpush1.bf16.msra.mxu0 %v4345_v0  ;;  %1931 = vmatprep.subr.bf16.mxu1 %v4356_v11  ;;  %v112_v0 = vld [vmem:[%s5714_s0 + $0x1b0] sm:$0xff]  ;;  %v4372_v11 = vld [vmem:[#allocation3 + $0x2a8] ss:$16 sps:$4 sm:$0xff]  }
  0xa6   :  { %1705 = vmatprep.subr.bf16.mxu0 %v4353_v10  ;;  %1707 = vmatprep.mubr.bf16.mxu0 %v5000_v14  ;;  %v4374_v10 = vld [vmem:[#allocation3 + $0x2ac] ss:$16 sps:$4 sm:$0xff]  }
  0xa7   :  { %1933 = vmatprep.mubr.bf16.mxu1 %v4718_v54  ;;  %v83_v54 = vld [vmem:[%s5714_s0 + $0xc8] sm:$0xff] }
  0xa8   :  { %1932 = vmatpush1.bf16.msra.mxu1 %v4354_v13  ;;  %v5038_v47 = vpack.c.bf16 %v83_v54, %v76_v40  ;;  %v4377_v13 = vld [vmem:[#allocation3 + $0x2cc] ss:$16 sps:$4 sm:$0xff]  }
  0xa9   :  { %1706 = vmatpush1.bf16.msra.mxu0 %v4351_v12  ;;  %2014 = vmatprep.subr.bf16.mxu1 %v4359_v23  ;;  %v111_v12 = vld [vmem:[%s5714_s0 + $0x1a8] sm:$0xff]  ;;  %v133_v40 = vld [vmem:[%s5714_s0 + $0x258] sm:$0xff] }
  0xaa   :  { %1788 = vmatprep.subr.bf16.mxu0 %v4404_v58  ;;  %v4375_v23 = vld [vmem:[#allocation3 + $0x2c8] ss:$16 sps:$4 sm:$0xff]  }
  0xab   :  { %1934 = vmatmul.mubr.bf16.vlgmr.msra.gmra.mrb[32].mxu1 %v4742_v17  ;;  %v98_v17 = vld [vmem:[%s5714_s0 + $0x140] sm:$0xff]  ;;  %v147_v58 = vld [vmem:[%s5714_s0 + $0x2c8] sm:$0xff] }
  0xac   :  { %1708 = vmatmul.mubr.bf16.vlgmr.msra.gmra.mrb[0].mxu0 %v5018_v31  ;;  %2015 = vmatpush1.bf16.msra.mxu1 %v4357_v32  ;;  %v5040_v49 = vpack.c.bf16 %v98_v17, %v91_v42  ;;  %v4378_v32 = vld [vmem:[#allocation3 + $0x2e8] ss:$16 sps:$4 sm:$0xff]   ;;  %v4386_v17 = vld [vmem:[#allocation3 + $0x32c] ss:$16 sps:$4 sm:$0xff]  }
  0xad   :  { %1717 = vmatprep.mubr.bf16.mxu0 %v5020_v33  ;;  %2016 = vmatprep.subr.bf16.mxu1 %v4362_v34  ;;  %v125_v34 = vld [vmem:[%s5714_s0 + $0x218] sm:$0xff] }
  0xae   :  { %1943 = vmatprep.mubr.bf16.mxu1 %v4752_v24  ;;  %v90_v24 = vld [vmem:[%s5714_s0 + $0x100] sm:$0xff]  ;;  %1789 = vmatpush1.bf16.msra.mxu0 %v4402_v59  ;;  %v4387_v59 = vld [vmem:[#allocation3 + $0x348] ss:$16 sps:$4 sm:$0xff]  }
  0xaf   :  { %v5058_v5 = vpack.c.bf16 %v97_v62, %v90_v24  ;;  %v4392_v62 = vld [vmem:[#allocation3 + $0x36c] ss:$16 sps:$4 sm:$0xff]  }
  0xb0   :  { %2017 = vmatpush1.bf16.msra.mxu1 %v4360_v37  ;;  %v4383_v37 = vld [vmem:[#allocation3 + $0x30c] ss:$16 sps:$4 sm:$0xff]  }
  0xb1   :  { %2018 = vmatprep.subr.bf16.mxu1 %v4365_v41  ;;  %v4381_v41 = vld [vmem:[#allocation3 + $0x308] ss:$16 sps:$4 sm:$0xff]  }
  0xb3   :  { %1944 = vmatmul.mubr.bf16.gmra.mrb[36].mxu1 %v4780_v38  ;;  %v105_v38 = vld [vmem:[%s5714_s0 + $0x178] sm:$0xff] }
  0xb4   :  { %1718 = vmatmul.mubr.bf16.gmra.mrb[4].mxu0 %v5038_v47  ;;  %2019 = vmatpush1.bf16.msra.mxu1 %v4363_v48  ;;  %v5060_v9 = vpack.c.bf16 %v112_v0, %v105_v38  ;;  %v4384_v48 = vld [vmem:[#allocation3 + $0x328] ss:$16 sps:$4 sm:$0xff]   ;;  %v146_v0 = vld [vmem:[%s5714_s0 + $0x2c0] sm:$0xff] }
  0xb5   :  { %1727 = vmatprep.mubr.bf16.mxu0 %v5040_v49  ;;  %2020 = vmatprep.subr.bf16.mxu1 %v4368_v56  ;;  %v139_v56 = vld [vmem:[%s5714_s0 + $0x288] sm:$0xff] }
  0xb6   :  { %1953 = vmatprep.mubr.bf16.mxu1 %v4790_v45  ;;  %v104_v45 = vld [vmem:[%s5714_s0 + $0x170] sm:$0xff]  ;;  %v4390_v38 = vld [vmem:[#allocation3 + $0x368] ss:$16 sps:$4 sm:$0xff]  }
  0xb7   :  { %v5078_v22 = vpack.c.bf16 %v111_v12, %v104_v45  ;;  %v4393_v45 = vld [vmem:[#allocation3 + $0x388] ss:$16 sps:$4 sm:$0xff]  }
  0xb8   :  { %2021 = vmatpush1.bf16.msra.mxu1 %v4366_v57  ;;  %v4389_v57 = vld [vmem:[#allocation3 + $0x34c] ss:$16 sps:$4 sm:$0xff]  }
  0xb9   :  { %2022 = vmatprep.subr.bf16.mxu1 %v4371_v63 }
  0xbb   :  { %1954 = vmatmul.mubr.bf16.gmra.mrb[40].mxu1 %v4816_v60  ;;  %v126_v60 = vld [vmem:[%s5714_s0 + $0x220] sm:$0xff] }
  0xbc   :  { %1728 = vmatmul.mubr.bf16.gmra.mrb[8].mxu0 %v5058_v5  ;;  %2023 = vmatpush1.bf16.msra.mxu1 %v4369_v6  ;;  %v5080_v27 = vpack.c.bf16 %v126_v60, %v119_v21  ;;  %v4395_v6 = vld [vmem:[#allocation3 + $0x38c] ss:$16 sps:$4 sm:$0xff]   ;;  %v4396_v21 = vld [vmem:[#allocation3 + $0x3a8] ss:$16 sps:$4 sm:$0xff]  }
  0xbd   :  { %1737 = vmatprep.mubr.bf16.mxu0 %v5060_v9  ;;  %2024 = vmatprep.subr.bf16.mxu1 %v4374_v10  ;;  %v161_v10 = vld [vmem:[%s5714_s0 + $0x338] sm:$0xff]  ;;  %v160_v60 = vld [vmem:[%s5714_s0 + $0x330] sm:$0xff] }
  0xbe   :  { %1963 = vmatprep.mubr.bf16.mxu1 %v4826_v3  ;;  %v118_v3 = vld [vmem:[%s5714_s0 + $0x1e0] sm:$0xff] }
  0xbf   :  { %v5098_v54 = vpack.c.bf16 %v125_v34, %v118_v3  ;;  %v4407_v3 = vld [vmem:[#allocation3 + $0x3ec] ss:$16 sps:$4 sm:$0xff]   ;;  %v4405_v34 = vld [vmem:[#allocation3 + $0x3e8] ss:$16 sps:$4 sm:$0xff]  }
  0xc0   :  { %2025 = vmatpush1.bf16.msra.mxu1 %v4372_v11  ;;  %v168_v11 = vld [vmem:[%s5714_s0 + $0x370] sm:$0xff] }
  0xc1   :  { %2026 = vmatprep.subr.bf16.mxu1 %v4377_v13  ;;  %v4398_v13 = vld [vmem:[#allocation3 + $0x3ac] ss:$16 sps:$4 sm:$0xff]  }
  0xc3   :  { %1964 = vmatmul.mubr.bf16.gmra.mrb[44].mxu1 %v4852_v16  ;;  %v140_v16 = vld [vmem:[%s5714_s0 + $0x290] sm:$0xff] }
  0xc4   :  { %1738 = vmatmul.mubr.bf16.gmra.mrb[12].mxu0 %v5078_v22  ;;  %2027 = vmatpush1.bf16.msra.mxu1 %v4375_v23  ;;  %v5100_v42 = vpack.c.bf16 %v140_v16, %v133_v40  ;;  %v167_v23 = vld [vmem:[%s5714_s0 + $0x368] sm:$0xff] }
  0xc5   :  { %1747 = vmatprep.mubr.bf16.mxu0 %v5080_v27  ;;  %2028 = vmatprep.subr.bf16.mxu1 %v4380_v30  ;;  %v4399_v30 = vld [vmem:[#allocation3 + $0x3c8] ss:$16 sps:$4 sm:$0xff]  }
  0xc6   :  { %1973 = vmatprep.mubr.bf16.mxu1 %v4862_v28  ;;  %v132_v28 = vld [vmem:[%s5714_s0 + $0x250] sm:$0xff]  ;;  %v4408_v16 = vld [vmem:[#allocation3 + $0x408] ss:$16 sps:$4 sm:$0xff]  }
  0xc7   :  { %v5118_v24 = vpack.c.bf16 %v139_v56, %v132_v28  ;;  %v4419_v56 = vld [vmem:[#allocation3 + $0x46c] ss:$16 sps:$4 sm:$0xff]  }
  0xc8   :  { %2029 = vmatpush1.bf16.msra.mxu1 %v4378_v32  ;;  %v5152_v32 = vpack.c.bf16 %v167_v23, %v160_v60  ;;  %v4437_v60 = vld [vmem:[#allocation3 + $0x52c] ss:$16 sps:$4 sm:$0xff]  }
  0xc9   :  { %2030 = vmatprep.subr.bf16.mxu1 %v4383_v37  ;;  %v64_v37 = vld [vmem:[%s5714_s0 + $0x30] sm:$0xff] }
  0xca   :  { %v4461_v23 = vld [vmem:[#allocation6 + $0x4] ss:$8 sps:$4 sm:$0xff]  }
  0xcb   :  { %1974 = vmatmul.mubr.bf16.gmra.mrb[48].mxu1 %v4888_v43  ;;  %v154_v43 = vld [vmem:[%s5714_s0 + $0x300] sm:$0xff]  ;;  %2909 = vmatprep.subr.bf16.mxu0 %v4461_v23  ;;  %v4486_v23 = vld [vmem:[#allocation6 + $0x90] ss:$8 sps:$4 sm:$0xff]  }
  0xcc   :  { %1748 = vmatmul.mubr.bf16.gmra.mrb[16].mxu0 %v5098_v54  ;;  %2031 = vmatpush1.bf16.msra.mxu1 %v4381_v41  ;;  %v5120_v63 = vpack.c.bf16 %v154_v43, %v147_v58  ;;  %v4413_v41 = vld [vmem:[#allocation3 + $0x42c] ss:$16 sps:$4 sm:$0xff]  }
  0xcd   :  { %1757 = vmatprep.mubr.bf16.mxu0 %v5100_v42  ;;  %2032 = vmatprep.subr.bf16.mxu1 %v4386_v17  ;;  %v85_v17 = vld [vmem:[%s5714_s0 + $0xd8] sm:$0xff]  ;;  %v99_v58 = vld [vmem:[%s5714_s0 + $0x148] sm:$0xff] }
  0xce   :  { %1983 = vmatprep.mubr.bf16.mxu1 %v4898_v52  ;;  %v153_v52 = vld [vmem:[%s5714_s0 + $0x2f8] sm:$0xff] }
  0xcf   :  { %v5138_v12 = vpack.c.bf16 %v153_v52, %v146_v0  ;;  %v4422_v43 = vld [vmem:[#allocation3 + $0x48c] ss:$16 sps:$4 sm:$0xff]  }
  0xd0   :  { %2033 = vmatpush1.bf16.msra.mxu1 %v4384_v48  ;;  %v4416_v48 = vld [vmem:[#allocation3 + $0x44c] ss:$16 sps:$4 sm:$0xff]  }
  0xd1   :  { %2034 = vmatprep.subr.bf16.mxu1 %v4389_v57  ;;  %v4417_v57 = vld [vmem:[#allocation3 + $0x468] ss:$16 sps:$4 sm:$0xff]   ;;  %v4428_v52 = vld [vmem:[#allocation3 + $0x4cc] ss:$16 sps:$4 sm:$0xff]  }
  0xd2   :  { %v113_v0 = vld [vmem:[%s5714_s0 + $0x1b8] sm:$0xff] }
  0xd3   :  { %1984 = vmatmul.mubr.bf16.gmra.mrb[52].mxu1 %v4924_v7  ;;  %v5140_v7 = vpack.c.bf16 %v168_v11, %v161_v10  ;;  %v4431_v10 = vld [vmem:[#allocation3 + $0x4ec] ss:$16 sps:$4 sm:$0xff]   ;;  %v4429_v11 = vld [vmem:[#allocation3 + $0x4e8] ss:$16 sps:$4 sm:$0xff]  }
  0xd4   :  { %1758 = vmatmul.mubr.bf16.gmra.mrb[20].mxu0 %v5118_v24  ;;  %2035 = vmatpush1.bf16.msra.mxu1 %v4387_v59 }
  0xd5   :  { %1767 = vmatprep.mubr.bf16.mxu0 %v5120_v63  ;;  %2036 = vmatprep.subr.bf16.mxu1 %v4392_v62  ;;  %v4425_v62 = vld [vmem:[#allocation3 + $0x4ac] ss:$16 sps:$4 sm:$0xff]  }
  0xd6   :  { %1993 = vmatprep.mubr.bf16.mxu1 %v4934_v15  ;;  %v4401_v15 = vld [vmem:[#allocation3 + $0x3cc] ss:$16 sps:$4 sm:$0xff]  }
  0xd8   :  { %2037 = vmatpush1.bf16.msra.mxu1 %v4390_v38  ;;  %v4423_v38 = vld [vmem:[#allocation3 + $0x4a8] ss:$16 sps:$4 sm:$0xff]  }
  0xd9   :  { %2038 = vmatprep.subr.bf16.mxu1 %v4395_v6 }
  0xdb   :  { %1994 = vmatmul.mubr.bf16.gmra.mrb[56].mxu1 %v4957_v35  ;;  %v71_v35 = vld [vmem:[%s5714_s0 + $0x68] sm:$0xff] }
  0xdc   :  { %1768 = vmatmul.mubr.bf16.gmra.mrb[24].mxu0 %v5138_v12  ;;  %2039 = vmatpush1.bf16.msra.mxu1 %v4393_v45  ;;  %v5164_v40 = vpack.c.bf16 %v71_v35, %v64_v37  ;;  %v127_v45 = vld [vmem:[%s5714_s0 + $0x228] sm:$0xff] }
  0xdd   :  { %1777 = vmatprep.mubr.bf16.mxu0 %v5140_v7  ;;  %2040 = vmatprep.subr.bf16.mxu1 %v4398_v13  ;;  %v4434_v13 = vld [vmem:[#allocation3 + $0x50c] ss:$16 sps:$4 sm:$0xff]   ;;  %v4438_v35 = vld [vmem:[#allocation3 + $0x548] ss:$16 sps:$4 sm:$0xff]  }
  0xde   :  { %2003 = vmatprep.mubr.bf16.mxu1 %v4970_v50  ;;  %v4410_v50 = vld [vmem:[#allocation3 + $0x40c] ss:$16 sps:$4 sm:$0xff]  }
  0xdf   :  { %v4440_v37 = vld [vmem:[#allocation3 + $0x54c] ss:$16 sps:$4 sm:$0xff]  }
  0xe0   :  { %2041 = vmatpush1.bf16.msra.mxu1 %v4396_v21 }
  0xe1   :  { %2042 = vmatprep.subr.bf16.mxu1 %v4401_v15  ;;  %v4435_v15 = vld [vmem:[#allocation3 + $0x528] ss:$16 sps:$4 sm:$0xff]  }
  0xe3   :  { %2004 = vmatmul.mubr.bf16.gmra.mrb[60].mxu1 %v4990_v1  ;;  %v4411_v1 = vld [vmem:[#allocation3 + $0x428] ss:$16 sps:$4 sm:$0xff]  }
  0xe4   :  { %1778 = vmatmul.mubr.bf16.gmra.mrb[28].mxu0 %v5152_v32  ;;  %2043 = vmatpush1.bf16.msra.mxu1 %v4399_v30  ;;  %v4459_v30 = vld [vmem:[#allocation6] ss:$8 sps:$4 sm:$0xff]  }
  0xe5   :  { %1820 = vmatprep.mubr.bf16.mxu0 %v4637_v26  ;;  %2044 = vmatprep.subr.bf16.mxu1 %v4407_v3  ;;  %v141_v3 = vld [vmem:[%s5714_s0 + $0x298] sm:$0xff] }
  0xe6   :  { %2046 = vmatprep.mubr.bf16.mxu1 %v4720_v55  ;;  %v78_v55 = vld [vmem:[%s5714_s0 + $0xa0] sm:$0xff] }
  0xe7   :  { %v5177_v28 = vpack.c.bf16 %v85_v17, %v78_v55  ;;  %v155_v55 = vld [vmem:[%s5714_s0 + $0x308] sm:$0xff] }
  0xe8   :  { %2045 = vmatpush1.bf16.msra.mxu1 %v4405_v34  ;;  %v4464_v34 = vld [vmem:[#allocation6 + $0x14] ss:$8 sps:$4 sm:$0xff]  }
  0xe9   :  { %2127 = vmatprep.subr.bf16.mxu1 %v4410_v50  ;;  %v4443_v50 = vld [vmem:[#allocation3 + $0x56c] ss:$16 sps:$4 sm:$0xff]  }
  0xea   :  { %v4446_v17 = vld [vmem:[#allocation3 + $0x58c] ss:$16 sps:$4 sm:$0xff]  }
  0xeb   :  { %2047 = vmatmul.mubr.bf16.vlgmr.msra.gmra.mrb[32].mxu1 %v4744_v18  ;;  %v4414_v18 = vld [vmem:[#allocation3 + $0x448] ss:$16 sps:$4 sm:$0xff]  }
  0xec   :  { %3754 = vmatmul.mubr.msk.bf16.vlgmr.msra.gmra.mrb[0].mxu0 %vm1424_vm0, %v5164_v40  ;;  %2128 = vmatpush1.bf16.msra.mxu1 %v4408_v16  ;;  %v4462_v16 = vld [vmem:[#allocation6 + $0x10] ss:$8 sps:$4 sm:$0xff]  }
  0xed   :  { %1830 = vmatprep.mubr.bf16.mxu0 %v4637_v26  ;;  %2129 = vmatprep.subr.bf16.mxu1 %v4413_v41  ;;  %v4467_v41 = vld [vmem:[#allocation6 + $0x24] ss:$8 sps:$4 sm:$0xff]  }
  0xee   :  { %2056 = vmatprep.mubr.bf16.mxu1 %v4754_v25  ;;  %v92_v25 = vld [vmem:[%s5714_s0 + $0x110] sm:$0xff]  ;;  %2910 = vmatpush1.bf16.msra.mxu0 %v4459_v30 }
  0xef   :  { %v5190_v59 = vpack.c.bf16 %v99_v58, %v92_v25  ;;  %2911 = vmatprep.subr.bf16.mxu0 %v4464_v34  ;;  %v4447_v25 = vld [vmem:[#allocation3 + $0x5a8] ss:$16 sps:$4 sm:$0xff]  }
  0xf0   :  { %2130 = vmatpush1.bf16.msra.mxu1 %v4411_v1  ;;  %v4441_v1 = vld [vmem:[#allocation3 + $0x568] ss:$16 sps:$4 sm:$0xff]  }
  0xf1   :  { %2131 = vmatprep.subr.bf16.mxu1 %v4416_v48  ;;  %v4465_v48 = vld [vmem:[#allocation6 + $0x20] ss:$8 sps:$4 sm:$0xff]   ;;  %v4468_v58 = vld [vmem:[#allocation6 + $0x30] ss:$8 sps:$4 sm:$0xff]  }
  0xf2   :  { %2912 = vmatpush1.bf16.msra.mxu0 %v4462_v16  ;;  %v4492_v30 = vld [vmem:[#allocation6 + $0xb0] ss:$8 sps:$4 sm:$0xff]  }
  0xf3   :  { %2057 = vmatmul.mubr.bf16.gmra.mrb[36].mxu1 %v4782_v39  ;;  %v4420_v39 = vld [vmem:[#allocation3 + $0x488] ss:$16 sps:$4 sm:$0xff]   ;;  %2913 = vmatprep.subr.bf16.mxu0 %v4467_v41 }
  0xf4   :  { %3755 = vmatmul.mubr.msk.bf16.gmra.mrb[4].mxu0 %vm1424_vm0, %v5177_v28  ;;  %2132 = vmatpush1.bf16.msra.mxu1 %v4414_v18  ;;  %v4444_v18 = vld [vmem:[#allocation3 + $0x588] ss:$16 sps:$4 sm:$0xff]  }
  0xf5   :  { %1840 = vmatprep.mubr.bf16.mxu0 %v4637_v26  ;;  %2133 = vmatprep.subr.bf16.mxu1 %v4419_v56  ;;  %v4449_v56 = vld [vmem:[#allocation3 + $0x5ac] ss:$16 sps:$4 sm:$0xff]  }
  0xf6   :  { %2066 = vmatprep.mubr.bf16.mxu1 %v4792_v46  ;;  %v106_v46 = vld [vmem:[%s5714_s0 + $0x180] sm:$0xff]  ;;  %2914 = vmatpush1.bf16.msra.mxu0 %v4465_v48 }
  0xf7   :  { %v5203_v6 = vpack.c.bf16 %v113_v0, %v106_v46  ;;  %v4455_v46 = vld [vmem:[#allocation3 + $0x5ec] ss:$16 sps:$4 sm:$0xff]   ;;  %v4471_v0 = vld [vmem:[#allocation6 + $0x40] ss:$8 sps:$4 sm:$0xff]  }
  0xf8   :  { %2134 = vmatpush1.bf16.msra.mxu1 %v4417_v57  ;;  %v4470_v57 = vld [vmem:[#allocation6 + $0x34] ss:$8 sps:$4 sm:$0xff]  }
  0xf9   :  { %2135 = vmatprep.subr.bf16.mxu1 %v4422_v43  ;;  %v169_v43 = vld [vmem:[%s5714_s0 + $0x378] sm:$0xff]  ;;  %2915 = vmatprep.subr.bf16.mxu0 %v4470_v57 }
  0xfa   :  { %2916 = vmatpush1.bf16.msra.mxu0 %v4468_v58 }
  0xfb   :  { %2067 = vmatmul.mubr.bf16.gmra.mrb[40].mxu1 %v4818_v61  ;;  %v4426_v61 = vld [vmem:[#allocation3 + $0x4c8] ss:$16 sps:$4 sm:$0xff]  }
  0xfc   :  { %3756 = vmatmul.mubr.msk.bf16.gmra.mrb[8].mxu0 %vm1424_vm0, %v5190_v59  ;;  %2136 = vmatpush1.bf16.msra.mxu1 %v4420_v39  ;;  %v4473_v39 = vld [vmem:[#allocation6 + $0x44] ss:$8 sps:$4 sm:$0xff]  }
  0xfd   :  { %1850 = vmatprep.mubr.bf16.mxu0 %v4637_v26  ;;  %2137 = vmatprep.subr.bf16.mxu1 %v4425_v62  ;;  %v4452_v62 = vld [vmem:[#allocation3 + $0x5cc] ss:$16 sps:$4 sm:$0xff]  }
  0xfe   :  { %2076 = vmatprep.mubr.bf16.mxu1 %v4828_v4  ;;  %v120_v4 = vld [vmem:[%s5714_s0 + $0x1f0] sm:$0xff]  ;;  %2917 = vmatprep.subr.bf16.mxu0 %v4473_v39 }
  0xff   :  { %v5216_v21 = vpack.c.bf16 %v127_v45, %v120_v4  ;;  %2918 = vmatpush1.bf16.msra.mxu0 %v4471_v0  ;;  %v4456_v4 = vld [vmem:[#allocation3 + $0x608] ss:$16 sps:$4 sm:$0xff]  }
 0x100   :  { %2138 = vmatpush1.bf16.msra.mxu1 %v4423_v38  ;;  %v4450_v38 = vld [vmem:[#allocation3 + $0x5c8] ss:$16 sps:$4 sm:$0xff]  }
 0x101   :  { %2139 = vmatprep.subr.bf16.mxu1 %v4428_v52  ;;  %v4476_v52 = vld [vmem:[#allocation6 + $0x54] ss:$8 sps:$4 sm:$0xff]   ;;  %v4477_v45 = vld [vmem:[#allocation6 + $0x60] ss:$8 sps:$4 sm:$0xff]  }
 0x102   :  { %2919 = vmatprep.subr.bf16.mxu0 %v4476_v52 }
 0x103   :  { %2077 = vmatmul.mubr.bf16.gmra.mrb[44].mxu1 %v4854_v19  ;;  %v4432_v19 = vld [vmem:[#allocation3 + $0x508] ss:$16 sps:$4 sm:$0xff]  }
 0x104   :  { %3757 = vmatmul.mubr.msk.bf16.gmra.mrb[12].mxu0 %vm1424_vm0, %v5203_v6  ;;  %2140 = vmatpush1.bf16.msra.mxu1 %v4426_v61  ;;  %v4453_v61 = vld [vmem:[#allocation3 + $0x5e8] ss:$16 sps:$4 sm:$0xff]  }
 0x105   :  { %1860 = vmatprep.mubr.bf16.mxu0 %v4637_v26  ;;  %2141 = vmatprep.subr.bf16.mxu1 %v4431_v10  ;;  %v4474_v10 = vld [vmem:[#allocation6 + $0x50] ss:$8 sps:$4 sm:$0xff]  }
 0x106   :  { %2086 = vmatprep.mubr.bf16.mxu1 %v4864_v29  ;;  %v134_v29 = vld [vmem:[%s5714_s0 + $0x260] sm:$0xff]  ;;  %2920 = vmatpush1.bf16.msra.mxu0 %v4474_v10 }
 0x108   :  { %2142 = vmatpush1.bf16.msra.mxu1 %v4429_v11  ;;  %v4479_v11 = vld [vmem:[#allocation6 + $0x64] ss:$8 sps:$4 sm:$0xff]  }
 0x109   :  { %2143 = vmatprep.subr.bf16.mxu1 %v4434_v13  ;;  %2921 = vmatprep.subr.bf16.mxu0 %v4479_v11  ;;  %v4482_v13 = vld [vmem:[#allocation6 + $0x74] ss:$8 sps:$4 sm:$0xff]  }
 0x10a   :  { %2922 = vmatpush1.bf16.msra.mxu0 %v4477_v45 }
 0x10b   :  { %2087 = vmatmul.mubr.bf16.gmra.mrb[48].mxu1 %v4890_v44  ;;  %v5229_v44 = vpack.c.bf16 %v141_v3, %v134_v29  ;;  %2923 = vmatprep.subr.bf16.mxu0 %v4482_v13 }
 0x10c   :  { %3758 = vmatmul.mubr.msk.bf16.gmra.mrb[16].mxu0 %vm1424_vm0, %v5216_v21  ;;  %2144 = vmatpush1.bf16.msra.mxu1 %v4432_v19  ;;  %v4483_v19 = vld [vmem:[#allocation6 + $0x80] ss:$8 sps:$4 sm:$0xff]  }
 0x10d   :  { %1870 = vmatprep.mubr.bf16.mxu0 %v4637_v26  ;;  %2145 = vmatprep.subr.bf16.mxu1 %v4437_v60  ;;  %v4488_v60 = vld [vmem:[#allocation6 + $0x94] ss:$8 sps:$4 sm:$0xff]  }
 0x10e   :  { %2096 = vmatprep.mubr.bf16.mxu1 %v4900_v53  ;;  %v148_v53 = vld [vmem:[%s5714_s0 + $0x2d0] sm:$0xff] }
 0x110   :  { %2146 = vmatpush1.bf16.msra.mxu1 %v4435_v15  ;;  %v4491_v15 = vld [vmem:[#allocation6 + $0xa4] ss:$8 sps:$4 sm:$0xff]  }
 0x111   :  { %2147 = vmatprep.subr.bf16.mxu1 %v4440_v37  ;;  %v4495_v37 = vld [vmem:[#allocation6 + $0xc0] ss:$8 sps:$4 sm:$0xff]  }
 0x113   :  { %2097 = vmatmul.mubr.bf16.gmra.mrb[52].mxu1 %v4926_v8  ;;  %v5242_v8 = vpack.c.bf16 %v155_v55, %v148_v53  ;;  %v4501_v53 = vld [vmem:[#allocation6 + $0xe0] ss:$8 sps:$4 sm:$0xff]   ;;  %v4506_v55 = vld [vmem:[#allocation6 + $0xf4] ss:$8 sps:$4 sm:$0xff]  }
 0x114   :  { %3759 = vmatmul.mubr.msk.bf16.gmra.mrb[20].mxu0 %vm1424_vm0, %v5229_v44  ;;  %2148 = vmatpush1.bf16.msra.mxu1 %v4438_v35  ;;  %v4500_v35 = vld [vmem:[#allocation6 + $0xd4] ss:$8 sps:$4 sm:$0xff]  }
 0x115   :  { %1880 = vmatprep.mubr.bf16.mxu0 %v4637_v26  ;;  %2149 = vmatprep.subr.bf16.mxu1 %v4443_v50  ;;  %v4503_v50 = vld [vmem:[#allocation6 + $0xe4] ss:$8 sps:$4 sm:$0xff]  }
 0x116   :  { %2106 = vmatprep.mubr.bf16.mxu1 %v4936_v20  ;;  %v162_v20 = vld [vmem:[%s5714_s0 + $0x340] sm:$0xff] }
 0x118   :  { %2150 = vmatpush1.bf16.msra.mxu1 %v4441_v1 }
 0x119   :  { %2151 = vmatprep.subr.bf16.mxu1 %v4446_v17 }
 0x11b   :  { %2107 = vmatmul.mubr.bf16.gmra.mrb[56].mxu1 %v4959_v36  ;;  %v5255_v36 = vpack.c.bf16 %v169_v43, %v162_v20 }
 0x11c   :  { %3760 = vmatmul.mubr.msk.bf16.gmra.mrb[24].mxu0 %vm1424_vm0, %v5242_v8  ;;  %2152 = vmatpush1.bf16.msra.mxu1 %v4444_v18 }
 0x11d   :  { %1890 = vmatprep.mubr.bf16.mxu0 %v4637_v26  ;;  %2153 = vmatprep.subr.bf16.mxu1 %v4449_v56 }
 0x11e   :  { %2116 = vmatprep.mubr.bf16.mxu1 %v4972_v51  ;;  %v4458_v51 = vld [vmem:[#allocation3 + $0x60c] ss:$16 sps:$4 sm:$0xff]  }
 0x120   :  { %2154 = vmatpush1.bf16.msra.mxu1 %v4447_v25 }
 0x121   :  { %2155 = vmatprep.subr.bf16.mxu1 %v4452_v62 }
 0x123   :  { %2117 = vmatmul.mubr.bf16.gmra.mrb[60].mxu1 %v4992_v2  ;;  %v4480_v2 = vld [vmem:[#allocation6 + $0x70] ss:$8 sps:$4 sm:$0xff]  }
 0x124   :  { %3761 = vmatmul.mubr.msk.bf16.gmra.mrb[28].mxu0 %vm1424_vm0, %v5255_v36  ;;  %2156 = vmatpush1.bf16.msra.mxu1 %v4450_v38 }
 0x125   :  { %2159 = vmatprep.mubr.bf16.mxu1 %v5000_v14  ;;  %2157 = vmatprep.subr.bf16.mxu1 %v4455_v46  ;;  %v4485_v14 = vld [vmem:[#allocation6 + $0x84] ss:$8 sps:$4 sm:$0xff]  }
 0x126   :  { %2924 = vmatpush1.bf16.msra.mxu0 %v4480_v2 }
 0x127   :  { %2925 = vmatprep.subr.bf16.mxu0 %v4485_v14 }
 0x128   :  { %2158 = vmatpush1.bf16.msra.mxu1 %v4453_v61  ;;  %v4509_v61 = vld [vmem:[#allocation6 + $0x104] ss:$8 sps:$4 sm:$0xff]  }
 0x129   :  { %2240 = vmatprep.subr.bf16.mxu1 %v4458_v51 }
 0x12a   :  { %2926 = vmatpush1.bf16.msra.mxu0 %v4483_v19 }
 0x12b   :  { %2160 = vmatmul.mubr.bf16.vlgmr.msra.gmra.mrb[32].mxu1 %v5018_v31  ;;  %2927 = vmatprep.subr.bf16.mxu0 %v4488_v60  ;;  %v4489_v31 = vld [vmem:[#allocation6 + $0xa0] ss:$8 sps:$4 sm:$0xff]  }
 0x12c   :  { %2241 = vmatpush1.bf16.msra.mxu1 %v4456_v4  ;;  %2169 = vmatprep.mubr.bf16.mxu1 %v5020_v33  ;;  %v4494_v33 = vld [vmem:[#allocation6 + $0xb4] ss:$8 sps:$4 sm:$0xff]  }
 0x12e   :  { %2928 = vmatpush1.bf16.msra.mxu0 %v4486_v23 }
 0x12f   :  { %2929 = vmatprep.subr.bf16.mxu0 %v4491_v15 }
 0x132   :  { %2930 = vmatpush1.bf16.msra.mxu0 %v4489_v31 }
 0x133   :  { %2170 = vmatmul.mubr.bf16.gmra.mrb[36].mxu1 %v5038_v47  ;;  %2931 = vmatprep.subr.bf16.mxu0 %v4494_v33  ;;  %v4497_v47 = vld [vmem:[#allocation6 + $0xc4] ss:$8 sps:$4 sm:$0xff]  }
 0x134   :  { %2179 = vmatprep.mubr.bf16.mxu1 %v5040_v49 }
 0x136   :  { %2932 = vmatpush1.bf16.msra.mxu0 %v4492_v30 }
 0x137   :  { %2933 = vmatprep.subr.bf16.mxu0 %v4497_v47 }
 0x13a   :  { %2934 = vmatpush1.bf16.msra.mxu0 %v4495_v37 }
 0x13b   :  { %2180 = vmatmul.mubr.bf16.gmra.mrb[40].mxu1 %v5058_v5  ;;  %v4498_v5 = vld [vmem:[#allocation6 + $0xd0] ss:$8 sps:$4 sm:$0xff]   ;;  %2935 = vmatprep.subr.bf16.mxu0 %v4500_v35 }
 0x13c   :  { %2189 = vmatprep.mubr.bf16.mxu1 %v5060_v9 }
 0x13e   :  { %v5267_v29 = vpop.f32.mrb[0].mxu1  ;;  %2936 = vmatpush1.bf16.msra.mxu0 %v4498_v5 }
 0x13f   :  { %v5269_v3 = vpop.f32.mrb[1].mxu1  ;;  %2937 = vmatprep.subr.bf16.mxu0 %v4503_v50 }
 0x140   :  { %v5271_v49 = vpop.f32.mrb[2].mxu1 }
 0x141   :  { %v5273_v34 = vpop.f32.mrb[3].mxu1 }
 0x142   :  { %2938 = vmatpush1.bf16.msra.mxu0 %v4501_v53 }
 0x143   :  { %2190 = vmatmul.mubr.bf16.gmra.mrb[44].mxu1 %v5078_v22  ;;  %v4504_v22 = vld [vmem:[#allocation6 + $0xf0] ss:$8 sps:$4 sm:$0xff]   ;;  %2939 = vmatprep.subr.bf16.mxu0 %v4506_v55 }
 0x144   :  { %2199 = vmatprep.mubr.bf16.mxu1 %v5080_v27 }
 0x146   :  { %v5277_v9 = vpop.f32.mrb[4].mxu1  ;;  %2940 = vmatpush1.bf16.msra.mxu0 %v4504_v22 }
 0x147   :  { %v5279_v16 = vpop.f32.mrb[5].mxu1  ;;  %3022 = vmatprep.subr.bf16.mxu0 %v4509_v61 }
 0x148   :  { %v5281_v41 = vpop.f32.mrb[6].mxu1 }
 0x149   :  { %v5283_v1 = vpop.f32.mrb[7].mxu1 }
 0x14b   :  { %2200 = vmatmul.mubr.bf16.gmra.mrb[48].mxu1 %v5098_v54 }
 0x14c   :  { %2209 = vmatprep.mubr.bf16.mxu1 %v5100_v42 }
 0x14e   :  { %v5287_v27 = vpop.f32.mrb[8].mxu1 }
 0x14f   :  { %v5289_v17 = vpop.f32.mrb[9].mxu1 }
 0x150   :  { %v5291_v48 = vpop.f32.mrb[10].mxu1 }
 0x151   :  { %v5293_v18 = vpop.f32.mrb[11].mxu1 }
 0x153   :  { %2210 = vmatmul.mubr.bf16.gmra.mrb[52].mxu1 %v5118_v24 }
 0x154   :  { %2219 = vmatprep.mubr.bf16.mxu1 %v5120_v63 }
 0x156   :  { %v5297_v56 = vpop.f32.mrb[12].mxu1 }
 0x157   :  { %v5299_v54 = vpop.f32.mrb[13].mxu1 }
 0x158   :  { %v5301_v42 = vpop.f32.mrb[14].mxu1 }
 0x159   :  { %v5303_v57 = vpop.f32.mrb[15].mxu1 }
 0x15b   :  { %2220 = vmatmul.mubr.bf16.gmra.mrb[56].mxu1 %v5138_v12 }
 0x15c   :  { %2229 = vmatprep.mubr.bf16.mxu1 %v5140_v7 }
 0x15e   :  { %v5307_v25 = vpop.f32.mrb[16].mxu1 }
 0x15f   :  { %v5309_v58 = vpop.f32.mrb[17].mxu1 }
 0x160   :  { %v5311_v20 = vpop.f32.mrb[18].mxu1 }
 0x161   :  { %v5313_v24 = vpop.f32.mrb[19].mxu1 }
 0x163   :  { %2230 = vmatmul.mubr.bf16.gmra.mrb[60].mxu1 %v5152_v32 }
 0x164   :  { %2272 = vmatprep.mubr.bf16.mxu1 %v4637_v26 }
 0x166   :  { %v5317_v63 = vpop.f32.mrb[20].mxu1 }
 0x167   :  { %v5319_v43 = vpop.f32.mrb[21].mxu1 }
 0x168   :  { %v5321_v39 = vpop.f32.mrb[22].mxu1 }
 0x169   :  { %v5323_v12 = vpop.f32.mrb[23].mxu1 }
 0x16b   :  { %3762 = vmatmul.mubr.msk.bf16.vlgmr.msra.gmra.mrb[32].mxu1 %vm1424_vm0, %v5164_v40 }
 0x16c   :  { %2282 = vmatprep.mubr.bf16.mxu1 %v4637_v26 }
 0x16e   :  { %v5328_v7 = vpop.f32.mrb[24].mxu1 }
 0x16f   :  { %v5330_v62 = vpop.f32.mrb[25].mxu1 }
 0x170   :  { %v5332_v32 = vpop.f32.mrb[26].mxu1 }
 0x171   :  { %v5334_v38 = vpop.f32.mrb[27].mxu1 }
 0x173   :  { %3763 = vmatmul.mubr.msk.bf16.gmra.mrb[36].mxu1 %vm1424_vm0, %v5177_v28  ;;  %v424_v28 = vlaneseq }
 0x174   :  { %2292 = vmatprep.mubr.bf16.mxu1 %v4637_v26 }
 0x176   :  { %v5339_v46 = vpop.f32.mrb[28].mxu1 }
 0x177   :  { %v5341_v0 = vpop.f32.mrb[29].mxu1 }
 0x178   :  { %v5343_v40 = vpop.f32.mrb[30].mxu1 }
 0x179   :  { %v5345_v52 = vpop.f32.mrb[31].mxu1 }
 0x17b   :  { %3764 = vmatmul.mubr.msk.bf16.gmra.mrb[40].mxu1 %vm1424_vm0, %v5190_v59  ;;  %v5364_v59 = vshrl.u32 %v424_v28, 7 }
 0x17c   :  { %2302 = vmatprep.mubr.bf16.mxu1 %v4637_v26 }
 0x183   :  { %3765 = vmatmul.mubr.msk.bf16.gmra.mrb[44].mxu1 %vm1424_vm0, %v5203_v6  ;;  %v5367_v6 = vsub.s32 0, %v5364_v59 }
 0x184   :  { %2312 = vmatprep.mubr.bf16.mxu1 %v4637_v26 }
 0x18b   :  { %3766 = vmatmul.mubr.msk.bf16.gmra.mrb[48].mxu1 %vm1424_vm0, %v5216_v21  ;;  %v5372_v21 = vld [vmem:[%s5716_s2] sm:$0xf] }
 0x18c   :  { %2322 = vmatprep.mubr.bf16.mxu1 %v4637_v26 }
 0x193   :  { %3767 = vmatmul.mubr.msk.bf16.gmra.mrb[52].mxu1 %vm1424_vm0, %v5229_v44  ;;  %v430_v44 = vsub.s32 1, %v5364_v59 }
 0x194   :  { %2332 = vmatprep.mubr.bf16.mxu1 %v4637_v26 }
 0x19b   :  { %3768 = vmatmul.mubr.msk.bf16.gmra.mrb[56].mxu1 %vm1424_vm0, %v5242_v8  ;;  %v5377_v8 = vrot.slane %v5372_v21, %v5367_v6 }
 0x19c   :  { %2342 = vmatprep.mubr.bf16.mxu1 %v4637_v26  ;;  %v5382_v26 = vrot.slane %v5372_v21, %v430_v44 }
 0x19d   :  { %v1488_v11 = vadd.f32 %v5271_v49, %v5377_v8  ;;  %v1498_v5 = vadd.f32 %v5281_v41, %v5377_v8 }
 0x19e   :  { %v1486_v51 = vadd.f32 %v5269_v3, %v5382_v26  ;;  %v1490_v13 = vadd.f32 %v5273_v34, %v5382_v26  ;;  %v1496_v49 = vadd.f32 %v5279_v16, %v5382_v26  ;;  %v1500_v22 = vadd.f32 %v5283_v1, %v5382_v26  ;;  %v4512_v16 = vld [vmem:[#allocation6 + $0x114] ss:$8 sps:$4 sm:$0xff]  }
 0x1a3   :  { %3769 = vmatmul.mubr.msk.bf16.gmra.mrb[60].mxu1 %vm1424_vm0, %v5255_v36  ;;  %v1484_v36 = vadd.f32 %v5267_v29, %v5377_v8  ;;  %v1494_v29 = vadd.f32 %v5277_v9, %v5377_v8 }
 0x1bf   :  { %v1822_v10 = vpop.f32.mrb[0].mxu0 }
 0x1c0   :  { %v3836_v4 = vadd.f32 %v1822_v10, %v1484_v36  ;;  %v1824_v45 = vpop.f32.mrb[1].mxu0  ;;  %v4507_v36 = vld [vmem:[#allocation6 + $0x100] ss:$8 sps:$4 sm:$0xff]  }
 0x1c1   :  { %v3838_v2 = vadd.f32 %v1824_v45, %v1486_v51  ;;  %v1826_v14 = vpop.f32.mrb[2].mxu0 }
 0x1c2   :  { %v2353_v19 = vmul.f32 0.3, %v3836_v4  ;;  %v3840_v60 = vadd.f32 %v1826_v14, %v1488_v11  ;;  %v1828_v23 = vpop.f32.mrb[3].mxu0  ;;  %v1504_v14 = vadd.f32 %v5287_v27, %v5377_v8 }
 0x1c3   :  { %v2354_v15 = vmul.f32 0.3, %v3838_v2  ;;  %v3842_v31 = vadd.f32 %v1828_v23, %v1490_v13  ;;  %v1506_v23 = vadd.f32 %v5289_v17, %v5382_v26 }
 0x1c4   :  { %v2357_v33 = vmul.f32 0.3, %v3840_v60  ;;  %v2417_v47 = vmax.f32 %v3836_v4, %v2353_v19 }
 0x1c5   :  { %v2358_v30 = vmul.f32 0.3, %v3842_v31  ;;  %v2418_v37 = vmax.f32 %v3838_v2, %v2354_v15  ;;  %v4510_v2 = vld [vmem:[#allocation6 + $0x110] ss:$8 sps:$4 sm:$0xff]  }
 0x1c6   :  { %v2421_v3 = vmax.f32 %v3840_v60, %v2357_v33  ;;  %v4515_v60 = vld [vmem:[#allocation6 + $0x124] ss:$8 sps:$4 sm:$0xff]  }
 0x1c7   :  { %v2422_v35 = vmax.f32 %v3842_v31, %v2358_v30  ;;  %v1832_v34 = vpop.f32.mrb[4].mxu0  ;;  %v1508_v30 = vadd.f32 %v5291_v48, %v5377_v8 }
 0x1c8   :  { %v2481_v50 = vpack.c.bf16 %v2421_v3, %v2417_v47  ;;  %v3844_v53 = vadd.f32 %v1832_v34, %v1494_v29  ;;  %v1834_v55 = vpop.f32.mrb[5].mxu0  ;;  %v4513_v34 = vld [vmem:[#allocation6 + $0x120] ss:$8 sps:$4 sm:$0xff]  }
 0x1c9   :  { %v3846_v61 = vadd.f32 %v1834_v55, %v1496_v49  ;;  %v1836_v28 = vpop.f32.mrb[6].mxu0  ;;  %v2482_v9 = vpack.c.bf16 %v2422_v35, %v2418_v37  ;;  %v1510_v49 = vadd.f32 %v5293_v18, %v5382_v26  ;;  %v1514_v18 = vadd.f32 %v5297_v56, %v5377_v8 }
 0x1ca   :  { %v2361_v51 = vmul.f32 0.3, %v3844_v53  ;;  %v3848_v10 = vadd.f32 %v1836_v28, %v1498_v5  ;;  %v1838_v11 = vpop.f32.mrb[7].mxu0  ;;  %v4516_v28 = vld [vmem:[#allocation6 + $0x130] ss:$8 sps:$4 sm:$0xff]  }
 0x1cb   :  { %v2362_v4 = vmul.f32 0.3, %v3846_v61  ;;  %v3850_v45 = vadd.f32 %v1838_v11, %v1500_v22  ;;  %2941 = vmatprep.mubr.bf16.mxu0 %v2482_v9 }
 0x1cc   :  { %v2365_v13 = vmul.f32 0.3, %v3848_v10  ;;  %2942 = vmatmul.mubr.bf16.vlgmr.msra.gmra.mrb[32].mxu0 %v2481_v50  ;;  %v2425_v1 = vmax.f32 %v3844_v53, %v2361_v51  ;;  %v4518_v53 = vld [vmem:[#allocation6 + $0x134] ss:$8 sps:$4 sm:$0xff]   ;;  %v4521_v51 = vld [vmem:[#allocation6 + $0x144] ss:$8 sps:$4 sm:$0xff]  }
 0x1cd   :  { %v2366_v41 = vmul.f32 0.3, %v3850_v45  ;;  %3023 = vmatpush1.bf16.msra.mxu0 %v4507_v36  ;;  %v2426_v15 = vmax.f32 %v3846_v61, %v2362_v4 }
 0x1ce   :  { %v2429_v19 = vmax.f32 %v3848_v10, %v2365_v13  ;;  %3024 = vmatprep.subr.bf16.mxu0 %v4512_v16  ;;  %v1516_v10 = vadd.f32 %v5299_v54, %v5382_v26 }
 0x1cf   :  { %v2430_v31 = vmax.f32 %v3850_v45, %v2366_v41  ;;  %v1842_v33 = vpop.f32.mrb[8].mxu0  ;;  %v1518_v45 = vadd.f32 %v5301_v42, %v5377_v8 }
 0x1d0   :  { %v3852_v29 = vadd.f32 %v1842_v33, %v1504_v14  ;;  %v1844_v47 = vpop.f32.mrb[9].mxu0  ;;  %v2485_v3 = vpack.c.bf16 %v2429_v19, %v2425_v1  ;;  %v1520_v14 = vadd.f32 %v5303_v57, %v5382_v26  ;;  %v1524_v57 = vadd.f32 %v5307_v25, %v5377_v8 }
 0x1d1   :  { %v3854_v27 = vadd.f32 %v1844_v47, %v1506_v23  ;;  %v1846_v37 = vpop.f32.mrb[10].mxu0  ;;  %v2486_v35 = vpack.c.bf16 %v2430_v31, %v2426_v15  ;;  %3025 = vmatpush1.bf16.msra.mxu0 %v4510_v2  ;;  %v4524_v31 = vld [vmem:[#allocation6 + $0x154] ss:$8 sps:$4 sm:$0xff]   ;;  %v4522_v47 = vld [vmem:[#allocation6 + $0x150] ss:$8 sps:$4 sm:$0xff]  }
 0x1d2   :  { %v2369_v5 = vmul.f32 0.3, %v3852_v29  ;;  %v3856_v50 = vadd.f32 %v1846_v37, %v1508_v30  ;;  %v1848_v17 = vpop.f32.mrb[11].mxu0  ;;  %3026 = vmatprep.subr.bf16.mxu0 %v4515_v60  ;;  %v4519_v60 = vld [vmem:[#allocation6 + $0x140] ss:$8 sps:$4 sm:$0xff]   ;;  %v1526_v37 = vadd.f32 %v5309_v58, %v5382_v26 }
 0x1d3   :  { %v2370_v55 = vmul.f32 0.3, %v3854_v27  ;;  %v3858_v22 = vadd.f32 %v1848_v17, %v1510_v49  ;;  %2951 = vmatprep.mubr.bf16.mxu0 %v2486_v35 }
 0x1d4   :  { %v2373_v48 = vmul.f32 0.3, %v3856_v50  ;;  %2952 = vmatmul.mubr.bf16.gmra.mrb[36].mxu0 %v2485_v3  ;;  %v2433_v9 = vmax.f32 %v3852_v29, %v2369_v5 }
 0x1d5   :  { %v2374_v61 = vmul.f32 0.3, %v3858_v22  ;;  %3027 = vmatpush1.bf16.msra.mxu0 %v4513_v34  ;;  %v2434_v11 = vmax.f32 %v3854_v27, %v2370_v55  ;;  %v4527_v27 = vld [vmem:[#allocation6 + $0x164] ss:$8 sps:$4 sm:$0xff]  }
 0x1d6   :  { %v2437_v36 = vmax.f32 %v3856_v50, %v2373_v48  ;;  %3028 = vmatprep.subr.bf16.mxu0 %v4518_v53  ;;  %v1528_v50 = vadd.f32 %v5311_v20, %v5377_v8 }
 0x1d7   :  { %v2438_v16 = vmax.f32 %v3858_v22, %v2374_v61  ;;  %v1852_v4 = vpop.f32.mrb[12].mxu0  ;;  %v1530_v22 = vadd.f32 %v5313_v24, %v5382_v26  ;;  %v1534_v24 = vadd.f32 %v5317_v63, %v5377_v8 }
 0x1d8   :  { %v3860_v13 = vadd.f32 %v1852_v4, %v1514_v18  ;;  %v1854_v41 = vpop.f32.mrb[13].mxu0  ;;  %v2489_v2 = vpack.c.bf16 %v2437_v36, %v2433_v9  ;;  %v4530_v36 = vld [vmem:[#allocation6 + $0x174] ss:$8 sps:$4 sm:$0xff]  }
 0x1d9   :  { %v3862_v56 = vadd.f32 %v1854_v41, %v1516_v10  ;;  %v1856_v1 = vpop.f32.mrb[14].mxu0  ;;  %v2490_v19 = vpack.c.bf16 %v2438_v16, %v2434_v11  ;;  %3029 = vmatpush1.bf16.msra.mxu0 %v4516_v28  ;;  %v4525_v28 = vld [vmem:[#allocation6 + $0x160] ss:$8 sps:$4 sm:$0xff]   ;;  %v4528_v16 = vld [vmem:[#allocation6 + $0x170] ss:$8 sps:$4 sm:$0xff]   ;;  %v1536_v41 = vadd.f32 %v5319_v43, %v5382_v26 }
 0x1da   :  { %v2377_v23 = vmul.f32 0.3, %v3860_v13  ;;  %v3864_v15 = vadd.f32 %v1856_v1, %v1518_v45  ;;  %v1858_v54 = vpop.f32.mrb[15].mxu0  ;;  %3030 = vmatprep.subr.bf16.mxu0 %v4521_v51  ;;  %v1538_v1 = vadd.f32 %v5321_v39, %v5377_v8 }
 0x1db   :  { %v2378_v33 = vmul.f32 0.3, %v3862_v56  ;;  %v3866_v30 = vadd.f32 %v1858_v54, %v1520_v14  ;;  %2961 = vmatprep.mubr.bf16.mxu0 %v2490_v19 }
 0x1dc   :  { %v2381_v42 = vmul.f32 0.3, %v3864_v15  ;;  %2962 = vmatmul.mubr.bf16.gmra.mrb[40].mxu0 %v2489_v2  ;;  %v2441_v3 = vmax.f32 %v3860_v13, %v2377_v23  ;;  %v4533_v13 = vld [vmem:[#allocation6 + $0x184] ss:$8 sps:$4 sm:$0xff]  }
 0x1dd   :  { %v2382_v29 = vmul.f32 0.3, %v3866_v30  ;;  %3031 = vmatpush1.bf16.msra.mxu0 %v4519_v60  ;;  %v2442_v35 = vmax.f32 %v3862_v56, %v2378_v33  ;;  %v4531_v33 = vld [vmem:[#allocation6 + $0x180] ss:$8 sps:$4 sm:$0xff]  }
 0x1de   :  { %v2445_v49 = vmax.f32 %v3864_v15, %v2381_v42  ;;  %3032 = vmatprep.subr.bf16.mxu0 %v4524_v31  ;;  %v1540_v15 = vadd.f32 %v5323_v12, %v5382_v26  ;;  %v1544_v12 = vadd.f32 %v5328_v7, %v5377_v8 }
 0x1df   :  { %v2446_v34 = vmax.f32 %v3866_v30, %v2382_v29  ;;  %v1862_v5 = vpop.f32.mrb[16].mxu0  ;;  %v4536_v29 = vld [vmem:[#allocation6 + $0x194] ss:$8 sps:$4 sm:$0xff]  }
 0x1e0   :  { %v3868_v17 = vadd.f32 %v1862_v5, %v1524_v57  ;;  %v1864_v53 = vpop.f32.mrb[17].mxu0  ;;  %v2493_v55 = vpack.c.bf16 %v2445_v49, %v2441_v3  ;;  %v4534_v49 = vld [vmem:[#allocation6 + $0x190] ss:$8 sps:$4 sm:$0xff]  }
 0x1e1   :  { %v3870_v25 = vadd.f32 %v1864_v53, %v1526_v37  ;;  %v1866_v48 = vpop.f32.mrb[18].mxu0  ;;  %v2494_v61 = vpack.c.bf16 %v2446_v34, %v2442_v35  ;;  %3033 = vmatpush1.bf16.msra.mxu0 %v4522_v47  ;;  %v4539_v35 = vld [vmem:[#allocation6 + $0x1a4] ss:$8 sps:$4 sm:$0xff]   ;;  %v1546_v34 = vadd.f32 %v5330_v62, %v5382_v26  ;;  %v1548_v53 = vadd.f32 %v5332_v32, %v5377_v8 }
 0x1e2   :  { %v2385_v18 = vmul.f32 0.3, %v3868_v17  ;;  %v3872_v9 = vadd.f32 %v1866_v48, %v1528_v50  ;;  %v1868_v58 = vpop.f32.mrb[19].mxu0  ;;  %3034 = vmatprep.subr.bf16.mxu0 %v4527_v27  ;;  %v1550_v48 = vadd.f32 %v5334_v38, %v5382_v26  ;;  %v1554_v38 = vadd.f32 %v5339_v46, %v5377_v8 }
 0x1e3   :  { %v2386_v51 = vmul.f32 0.3, %v3870_v25  ;;  %v3874_v10 = vadd.f32 %v1868_v58, %v1530_v22  ;;  %2971 = vmatprep.mubr.bf16.mxu0 %v2494_v61 }
 0x1e4   :  { %v2389_v20 = vmul.f32 0.3, %v3872_v9  ;;  %2972 = vmatmul.mubr.bf16.gmra.mrb[44].mxu0 %v2493_v55  ;;  %v2449_v4 = vmax.f32 %v3868_v17, %v2385_v18  ;;  %v4537_v18 = vld [vmem:[#allocation6 + $0x1a0] ss:$8 sps:$4 sm:$0xff]  }
 0x1e5   :  { %v2390_v11 = vmul.f32 0.3, %v3874_v10  ;;  %3035 = vmatpush1.bf16.msra.mxu0 %v4525_v28  ;;  %v2450_v2 = vmax.f32 %v3870_v25, %v2386_v51 }
 0x1e6   :  { %v2453_v45 = vmax.f32 %v3872_v9, %v2389_v20  ;;  %3036 = vmatprep.subr.bf16.mxu0 %v4530_v36  ;;  %v4542_v36 = vld [vmem:[#allocation6 + $0x1b4] ss:$8 sps:$4 sm:$0xff]  }
 0x1e7   :  { %v2454_v14 = vmax.f32 %v3874_v10, %v2390_v11  ;;  %v1872_v56 = vpop.f32.mrb[20].mxu0  ;;  %v4540_v11 = vld [vmem:[#allocation6 + $0x1b0] ss:$8 sps:$4 sm:$0xff]  }
 0x1e8   :  { %v3876_v19 = vadd.f32 %v1872_v56, %v1534_v24  ;;  %v1874_v60 = vpop.f32.mrb[21].mxu0  ;;  %v2497_v23 = vpack.c.bf16 %v2453_v45, %v2449_v4  ;;  %v4545_v4 = vld [vmem:[#allocation6 + $0x1c4] ss:$8 sps:$4 sm:$0xff]   ;;  %v1556_v45 = vadd.f32 %v5341_v0, %v5382_v26 }
 0x1e9   :  { %v3878_v63 = vadd.f32 %v1874_v60, %v1536_v41  ;;  %v1876_v54 = vpop.f32.mrb[22].mxu0  ;;  %v2498_v31 = vpack.c.bf16 %v2454_v14, %v2450_v2  ;;  %3037 = vmatpush1.bf16.msra.mxu0 %v4528_v16  ;;  %v1558_v14 = vadd.f32 %v5343_v40, %v5377_v8  ;;  %v1560_v60 = vadd.f32 %v5345_v52, %v5382_v26  ;;  %v4551_v26 = vld [vmem:[#allocation6 + $0x1e4] ss:$8 sps:$4 sm:$0xff]  }
 0x1ea   :  { %v2393_v30 = vmul.f32 0.3, %v3876_v19  ;;  %v3880_v42 = vadd.f32 %v1876_v54, %v1538_v1  ;;  %v1878_v43 = vpop.f32.mrb[23].mxu0  ;;  %3038 = vmatprep.subr.bf16.mxu0 %v4533_v13 }
 0x1eb   :  { %v2394_v47 = vmul.f32 0.3, %v3878_v63  ;;  %v3882_v57 = vadd.f32 %v1878_v43, %v1540_v15  ;;  %2981 = vmatprep.mubr.bf16.mxu0 %v2498_v31  ;;  %v4546_v43 = vld [vmem:[#allocation6 + $0x1d0] ss:$8 sps:$4 sm:$0xff]  }
 0x1ec   :  { %v2397_v39 = vmul.f32 0.3, %v3880_v42  ;;  %2982 = vmatmul.mubr.bf16.gmra.mrb[48].mxu0 %v2497_v23  ;;  %v2457_v27 = vmax.f32 %v3876_v19, %v2393_v30 }
 0x1ed   :  { %v2398_v3 = vmul.f32 0.3, %v3882_v57  ;;  %3039 = vmatpush1.bf16.msra.mxu0 %v4531_v33  ;;  %v2458_v5 = vmax.f32 %v3878_v63, %v2394_v47  ;;  %v4543_v63 = vld [vmem:[#allocation6 + $0x1c0] ss:$8 sps:$4 sm:$0xff]   ;;  %v4548_v33 = vld [vmem:[#allocation6 + $0x1d4] ss:$8 sps:$4 sm:$0xff]  }
 0x1ee   :  { %v2461_v37 = vmax.f32 %v3880_v42, %v2397_v39  ;;  %3040 = vmatprep.subr.bf16.mxu0 %v4536_v29 }
 0x1ef   :  { %v2462_v50 = vmax.f32 %v3882_v57, %v2398_v3  ;;  %v1882_v17 = vpop.f32.mrb[24].mxu0 }
 0x1f0   :  { %v3884_v55 = vadd.f32 %v1882_v17, %v1544_v12  ;;  %v1884_v22 = vpop.f32.mrb[25].mxu0  ;;  %v2501_v25 = vpack.c.bf16 %v2461_v37, %v2457_v27  ;;  %v4554_v12 = vld [vmem:[#allocation6 + $0x1f4] ss:$8 sps:$4 sm:$0xff]   ;;  %v3264_v27 = vld [vmem:[%s5719_s5 + $0x8] sm:$0xff]  ;;  %v4552_v37 = vld [vmem:[#allocation6 + $0x1f0] ss:$8 sps:$4 sm:$0xff]  }
 0x1f1   :  { %v3886_v7 = vadd.f32 %v1884_v22, %v1546_v34  ;;  %v1886_v61 = vpop.f32.mrb[26].mxu0  ;;  %v2502_v28 = vpack.c.bf16 %v2462_v50, %v2458_v5  ;;  %3041 = vmatpush1.bf16.msra.mxu0 %v4534_v49  ;;  %v4549_v49 = vld [vmem:[#allocation6 + $0x1e0] ss:$8 sps:$4 sm:$0xff]   ;;  %3302 = vperm.xlu1 %4164, %v3264_v27   ;;  %v3265_v34 = vld [vmem:[%s5719_s5 + $0x10] sm:$0xff]  ;;  %v3266_v50 = vld [vmem:[%s5719_s5 + $0x18] sm:$0xff] }
 0x1f2   :  { %v2401_v9 = vmul.f32 0.3, %v3884_v55  ;;  %v3888_v58 = vadd.f32 %v1886_v61, %v1548_v53  ;;  %v1888_v62 = vpop.f32.mrb[27].mxu0  ;;  %3042 = vmatprep.subr.bf16.mxu0 %v4539_v35  ;;  %v3263_v35 = vld [vmem:[%s5719_s5] sm:$0xff]  ;;  %v3268_v5 = vld [vmem:[%s5719_s5 + $0x28] sm:$0xff]  ;;  %v3270_v17 = vld [vmem:[%s5719_s5 + $0x38] sm:$0xff] }
 0x1f3   :  { %v2402_v51 = vmul.f32 0.3, %v3886_v7  ;;  %v3890_v10 = vadd.f32 %v1888_v62, %v1550_v48  ;;  %2991 = vmatprep.mubr.bf16.mxu0 %v2502_v28  ;;  %3297 = vperm.xlu0 %4163, %v3263_v35   ;;  %v3267_v53 = vld [vmem:[%s5719_s5 + $0x20] sm:$0xff]  ;;  %v3269_v22 = vld [vmem:[%s5719_s5 + $0x30] sm:$0xff]  ;;  %v3278_v28 = vld [vmem:[%s5719_s5 + $0x78] sm:$0xff] }
 0x1f4   :  { %v2405_v32 = vmul.f32 0.3, %v3888_v58  ;;  %2992 = vmatmul.mubr.bf16.gmra.mrb[52].mxu0 %v2501_v25  ;;  %v2465_v16 = vmax.f32 %v3884_v55, %v2401_v9  ;;  %v3272_v55 = vld [vmem:[%s5719_s5 + $0x48] sm:$0xff]  ;;  %v3274_v25 = vld [vmem:[%s5719_s5 + $0x58] sm:$0xff]  ;;  %v3271_v48 = vld [vmem:[%s5719_s5 + $0x40] sm:$0xff] }
 0x1f5   :  { %v2406_v20 = vmul.f32 0.3, %v3890_v10  ;;  %3043 = vmatpush1.bf16.msra.mxu0 %v4537_v18  ;;  %v2466_v13 = vmax.f32 %v3886_v7, %v2402_v51  ;;  %3307 = vperm.xlu1 %4164, %v3265_v34   ;;  %v3276_v7 = vld [vmem:[%s5719_s5 + $0x68] sm:$0xff]  ;;  %v3273_v61 = vld [vmem:[%s5719_s5 + $0x50] sm:$0xff]  ;;  %v3275_v18 = vld [vmem:[%s5719_s5 + $0x60] sm:$0xff] }
 0x1f6   :  { %v2469_v24 = vmax.f32 %v3888_v58, %v2405_v32  ;;  %3044 = vmatprep.subr.bf16.mxu0 %v4542_v36  ;;  %v3280_v9 = vld [vmem:[%s5719_s5 + $0x88] sm:$0xff]  ;;  %v3277_v58 = vld [vmem:[%s5719_s5 + $0x70] sm:$0xff]  ;;  %v3282_v62 = vld [vmem:[%s5719_s5 + $0x98] sm:$0xff] }
 0x1f7   :  { %v2470_v41 = vmax.f32 %v3890_v10, %v2406_v20  ;;  %v1892_v2 = vpop.f32.mrb[28].mxu0  ;;  %3322 = vperm.xlu0 %4163, %v3268_v5   ;;  %v3279_v36 = vld [vmem:[%s5719_s5 + $0x80] sm:$0xff]  ;;  %v3284_v51 = vld [vmem:[%s5719_s5 + $0xa8] sm:$0xff]  ;;  %v3281_v10 = vld [vmem:[%s5719_s5 + $0x90] sm:$0xff] }
 0x1f8   :  { %v3892_v56 = vadd.f32 %v1892_v2, %v1554_v38  ;;  %v1894_v1 = vpop.f32.mrb[29].mxu0  ;;  %v2505_v19 = vpack.c.bf16 %v2469_v24, %v2465_v16  ;;  %v3286_v32 = vld [vmem:[%s5719_s5 + $0xb8] sm:$0xff]  ;;  %v3283_v20 = vld [vmem:[%s5719_s5 + $0xa0] sm:$0xff]  ;;  %v3285_v38 = vld [vmem:[%s5719_s5 + $0xb0] sm:$0xff] }
 0x1f9   :  { %v3894_v46 = vadd.f32 %v1894_v1, %v1556_v45  ;;  %v1896_v23 = vpop.f32.mrb[30].mxu0  ;;  %v2506_v15 = vpack.c.bf16 %v2470_v41, %v2466_v13  ;;  %3045 = vmatpush1.bf16.msra.mxu0 %v4540_v11  ;;  %3312 = vperm.xlu1 %4164, %v3266_v50   ;;  %v3288_v11 = vld [vmem:[%s5719_s5 + $0xc8] sm:$0xff]  ;;  %v3290_v16 = vld [vmem:[%s5719_s5 + $0xd8] sm:$0xff]  ;;  %v3287_v24 = vld [vmem:[%s5719_s5 + $0xc0] sm:$0xff]  ;;  %v434_v45 = vsub.s32 2, %v5364_v59  ;;  %v438_v13 = vsub.s32 3, %v5364_v59 }
 0x1fa   :  { %v2409_v54 = vmul.f32 0.3, %v3892_v56  ;;  %v3896_v31 = vadd.f32 %v1896_v23, %v1558_v14  ;;  %v1898_v0 = vpop.f32.mrb[31].mxu0  ;;  %3046 = vmatprep.subr.bf16.mxu0 %v4545_v4  ;;  %v3292_v4 = vld [vmem:[%s5719_s5 + $0xe8] sm:$0xff]  ;;  %v3289_v41 = vld [vmem:[%s5719_s5 + $0xd0] sm:$0xff] }
 0x1fb   :  { %v2410_v30 = vmul.f32 0.3, %v3894_v46  ;;  %v3898_v42 = vadd.f32 %v1898_v0, %v1560_v60  ;;  %3001 = vmatprep.mubr.bf16.mxu0 %v2506_v15  ;;  %3332 = vperm.xlu0 %4163, %v3270_v17   ;;  %v5538_v2 = vrot.slane %v5372_v21, %v434_v45  ;;  %v5541_v14 = vrot.slane %v5372_v21, %v438_v13  ;;  %v3293_v21 = vld [vmem:[%s5719_s5 + $0xf0] sm:$0xff] }
 0x1fc   :  { %v2413_v40 = vmul.f32 0.3, %v3896_v31  ;;  %3002 = vmatmul.mubr.bf16.gmra.mrb[56].mxu0 %v2505_v19  ;;  %v2473_v29 = vmax.f32 %v3892_v56, %v2409_v54  ;;  %v3291_v56 = vld [vmem:[%s5719_s5 + $0xe0] sm:$0xff] }
 0x1fd   :  { %v2414_v8 = vmul.f32 0.3, %v3898_v42  ;;  %3047 = vmatpush1.bf16.msra.mxu0 %v4543_v63  ;;  %v2474_v47 = vmax.f32 %v3894_v46, %v2410_v30  ;;  %3317 = vperm.xlu1 %4164, %v3267_v53  }
 0x1fe   :  { %v2477_v52 = vmax.f32 %v3896_v31, %v2413_v40  ;;  %3048 = vmatprep.subr.bf16.mxu0 %v4548_v33 }
 0x1ff   :  { %v2478_v57 = vmax.f32 %v3898_v42, %v2414_v8  ;;  %3342 = vperm.xlu0 %4163, %v3272_v55  }
 0x200   :  { %v2509_v39 = vpack.c.bf16 %v2477_v52, %v2473_v29 }
 0x201   :  { %v2510_v3 = vpack.c.bf16 %v2478_v57, %v2474_v47  ;;  %3049 = vmatpush1.bf16.msra.mxu0 %v4546_v43  ;;  %3327 = vperm.xlu1 %4164, %v3269_v22  }
 0x202   :  { %3050 = vmatprep.subr.bf16.mxu0 %v4551_v26 }
 0x203   :  { %3011 = vmatprep.mubr.bf16.mxu0 %v2510_v3  ;;  %3352 = vperm.xlu0 %4163, %v3274_v25  }
 0x204   :  { %3012 = vmatmul.mubr.bf16.gmra.mrb[60].mxu0 %v2509_v39 }
 0x205   :  { %3051 = vmatpush1.bf16.msra.mxu0 %v4549_v49  ;;  %3337 = vperm.xlu1 %4164, %v3271_v48  }
 0x206   :  { %3052 = vmatprep.subr.bf16.mxu0 %v4554_v12 }
 0x207   :  { %3362 = vperm.xlu0 %4163, %v3276_v7  }
 0x209   :  { %3053 = vmatpush1.bf16.msra.mxu0 %v4552_v37  ;;  %3347 = vperm.xlu1 %4164, %v3273_v61  }
 0x20b   :  { %3372 = vperm.xlu0 %4163, %v3278_v28  }
 0x20d   :  { %3357 = vperm.xlu1 %4164, %v3275_v18  }
 0x20f   :  { %3382 = vperm.xlu0 %4163, %v3280_v9  }
 0x211   :  { %3367 = vperm.xlu1 %4164, %v3277_v58  }
 0x213   :  { %3392 = vperm.xlu0 %4163, %v3282_v62  }
 0x215   :  { %3377 = vperm.xlu1 %4164, %v3279_v36  }
 0x217   :  { %3402 = vperm.xlu0 %4163, %v3284_v51  }
 0x219   :  { %3387 = vperm.xlu1 %4164, %v3281_v10  }
 0x21b   :  { %3412 = vperm.xlu0 %4163, %v3286_v32  }
 0x21d   :  { %3397 = vperm.xlu1 %4164, %v3283_v20  }
 0x21f   :  { %3422 = vperm.xlu0 %4163, %v3288_v11  }
 0x221   :  { %3407 = vperm.xlu1 %4164, %v3285_v38  }
 0x223   :  { %3432 = vperm.xlu0 %4163, %v3290_v16  }
 0x225   :  { %3417 = vperm.xlu1 %4164, %v3287_v24  }
 0x227   :  { %3442 = vperm.xlu0 %4163, %v3292_v4  }
 0x229   :  { %3427 = vperm.xlu1 %4164, %v3289_v41  }
 0x22d   :  { %3437 = vperm.xlu1 %4164, %v3291_v56  }
 0x231   :  { %3447 = vperm.xlu1 %4164, %v3293_v21  }
 0x23e   :  { %v2274_v1 = vpop.f32.mrb[32].mxu1 }
 0x23f   :  { %v3899_v19 = vadd.f32 %v2274_v1, %v5538_v2  ;;  %v2276_v60 = vpop.f32.mrb[33].mxu1 }
 0x240   :  { %v3900_v46 = vadd.f32 %v2276_v60, %v5541_v14  ;;  %v2278_v23 = vpop.f32.mrb[34].mxu1 }
 0x241   :  { %v2355_v15 = vmul.f32 0.3, %v3899_v19  ;;  %v3901_v63 = vadd.f32 %v2278_v23, %v5538_v2  ;;  %v2280_v54 = vpop.f32.mrb[35].mxu1 }
 0x242   :  { %v2356_v31 = vmul.f32 0.3, %v3900_v46  ;;  %v3902_v0 = vadd.f32 %v2280_v54, %v5541_v14 }
 0x243   :  { %v2359_v33 = vmul.f32 0.3, %v3901_v63  ;;  %v2419_v42 = vmax.f32 %v3899_v19, %v2355_v15 }
 0x244   :  { %v2360_v30 = vmul.f32 0.3, %v3902_v0  ;;  %v2420_v8 = vmax.f32 %v3900_v46, %v2356_v31 }
 0x245   :  { %v2423_v40 = vmax.f32 %v3901_v63, %v2359_v33 }
 0x246   :  { %v2424_v43 = vmax.f32 %v3902_v0, %v2360_v30  ;;  %v2284_v29 = vpop.f32.mrb[36].mxu1 }
 0x247   :  { %v2483_v52 = vpack.c.bf16 %v2423_v40, %v2419_v42  ;;  %v3903_v26 = vadd.f32 %v2284_v29, %v5538_v2  ;;  %v2286_v47 = vpop.f32.mrb[37].mxu1 }
 0x248   :  { %v3904_v57 = vadd.f32 %v2286_v47, %v5541_v14  ;;  %v2288_v39 = vpop.f32.mrb[38].mxu1  ;;  %v2484_v3 = vpack.c.bf16 %v2424_v43, %v2420_v8 }
 0x249   :  { %v2363_v49 = vmul.f32 0.3, %v3903_v26  ;;  %v3905_v12 = vadd.f32 %v2288_v39, %v5538_v2  ;;  %v2290_v27 = vpop.f32.mrb[39].mxu1 }
 0x24a   :  { %v2364_v37 = vmul.f32 0.3, %v3904_v57  ;;  %v3906_v35 = vadd.f32 %v2290_v27, %v5541_v14  ;;  %3054 = vmatprep.mubr.bf16.mxu0 %v2484_v3 }
 0x24b   :  { %v2367_v34 = vmul.f32 0.3, %v3905_v12  ;;  %3055 = vmatmul.mubr.bf16.vlgmr.msra.gmra.mrb[32].mxu0 %v2483_v52  ;;  %v2427_v50 = vmax.f32 %v3903_v26, %v2363_v49 }
 0x24c   :  { %v2368_v5 = vmul.f32 0.3, %v3906_v35  ;;  %v2428_v53 = vmax.f32 %v3904_v57, %v2364_v37 }
 0x24d   :  { %v2431_v17 = vmax.f32 %v3905_v12, %v2367_v34 }
 0x24e   :  { %v2432_v55 = vmax.f32 %v3906_v35, %v2368_v5  ;;  %v2294_v22 = vpop.f32.mrb[40].mxu1 }
 0x24f   :  { %v3907_v25 = vadd.f32 %v2294_v22, %v5538_v2  ;;  %v2296_v48 = vpop.f32.mrb[41].mxu1  ;;  %v2487_v7 = vpack.c.bf16 %v2431_v17, %v2427_v50 }
 0x250   :  { %v3908_v61 = vadd.f32 %v2296_v48, %v5541_v14  ;;  %v2298_v28 = vpop.f32.mrb[42].mxu1  ;;  %v2488_v18 = vpack.c.bf16 %v2432_v55, %v2428_v53 }
 0x251   :  { %v2371_v9 = vmul.f32 0.3, %v3907_v25  ;;  %v3909_v58 = vadd.f32 %v2298_v28, %v5538_v2  ;;  %v2300_v62 = vpop.f32.mrb[43].mxu1 }
 0x252   :  { %v2372_v36 = vmul.f32 0.3, %v3908_v61  ;;  %v3910_v51 = vadd.f32 %v2300_v62, %v5541_v14  ;;  %3064 = vmatprep.mubr.bf16.mxu0 %v2488_v18 }
 0x253   :  { %v2375_v10 = vmul.f32 0.3, %v3909_v58  ;;  %3065 = vmatmul.mubr.bf16.gmra.mrb[36].mxu0 %v2487_v7  ;;  %v2435_v20 = vmax.f32 %v3907_v25, %v2371_v9 }
 0x254   :  { %v2376_v32 = vmul.f32 0.3, %v3910_v51  ;;  %v2436_v38 = vmax.f32 %v3908_v61, %v2372_v36 }
 0x255   :  { %v2439_v11 = vmax.f32 %v3909_v58, %v2375_v10 }
 0x256   :  { %v2440_v16 = vmax.f32 %v3910_v51, %v2376_v32  ;;  %v2304_v24 = vpop.f32.mrb[44].mxu1 }
 0x257   :  { %v3911_v4 = vadd.f32 %v2304_v24, %v5538_v2  ;;  %v2306_v45 = vpop.f32.mrb[45].mxu1  ;;  %v2491_v13 = vpack.c.bf16 %v2439_v11, %v2435_v20 }
 0x258   :  { %v3912_v41 = vadd.f32 %v2306_v45, %v5541_v14  ;;  %v2308_v56 = vpop.f32.mrb[46].mxu1  ;;  %v2492_v1 = vpack.c.bf16 %v2440_v16, %v2436_v38 }
 0x259   :  { %v2379_v19 = vmul.f32 0.3, %v3911_v4  ;;  %v3913_v60 = vadd.f32 %v2308_v56, %v5538_v2  ;;  %v2310_v46 = vpop.f32.mrb[47].mxu1 }
 0x25a   :  { %v2380_v23 = vmul.f32 0.3, %v3912_v41  ;;  %v3914_v15 = vadd.f32 %v2310_v46, %v5541_v14  ;;  %3074 = vmatprep.mubr.bf16.mxu0 %v2492_v1 }
 0x25b   :  { %v2383_v63 = vmul.f32 0.3, %v3913_v60  ;;  %3075 = vmatmul.mubr.bf16.gmra.mrb[40].mxu0 %v2491_v13  ;;  %v2443_v21 = vmax.f32 %v3911_v4, %v2379_v19 }
 0x25c   :  { %v2384_v54 = vmul.f32 0.3, %v3914_v15  ;;  %v2444_v0 = vmax.f32 %v3912_v41, %v2380_v23 }
 0x25d   :  { %v2447_v31 = vmax.f32 %v3913_v60, %v2383_v63 }
 0x25e   :  { %v2448_v33 = vmax.f32 %v3914_v15, %v2384_v54  ;;  %v2314_v30 = vpop.f32.mrb[48].mxu1 }
 0x25f   :  { %v3915_v42 = vadd.f32 %v2314_v30, %v5538_v2  ;;  %v2316_v40 = vpop.f32.mrb[49].mxu1  ;;  %v2495_v8 = vpack.c.bf16 %v2447_v31, %v2443_v21 }
 0x260   :  { %v3916_v43 = vadd.f32 %v2316_v40, %v5541_v14  ;;  %v2318_v29 = vpop.f32.mrb[50].mxu1  ;;  %v2496_v52 = vpack.c.bf16 %v2448_v33, %v2444_v0 }
 0x261   :  { %v2387_v26 = vmul.f32 0.3, %v3915_v42  ;;  %v3917_v47 = vadd.f32 %v2318_v29, %v5538_v2  ;;  %v2320_v57 = vpop.f32.mrb[51].mxu1 }
 0x262   :  { %v2388_v39 = vmul.f32 0.3, %v3916_v43  ;;  %v3918_v3 = vadd.f32 %v2320_v57, %v5541_v14  ;;  %3084 = vmatprep.mubr.bf16.mxu0 %v2496_v52 }
 0x263   :  { %v2391_v49 = vmul.f32 0.3, %v3917_v47  ;;  %3085 = vmatmul.mubr.bf16.gmra.mrb[44].mxu0 %v2495_v8  ;;  %v2451_v27 = vmax.f32 %v3915_v42, %v2387_v26 }
 0x264   :  { %v2392_v12 = vmul.f32 0.3, %v3918_v3  ;;  %v2452_v35 = vmax.f32 %v3916_v43, %v2388_v39 }
 0x265   :  { %v2455_v37 = vmax.f32 %v3917_v47, %v2391_v49 }
 0x266   :  { %v2456_v34 = vmax.f32 %v3918_v3, %v2392_v12  ;;  %v2324_v5 = vpop.f32.mrb[52].mxu1 }
 0x267   :  { %v3919_v50 = vadd.f32 %v2324_v5, %v5538_v2  ;;  %v2326_v17 = vpop.f32.mrb[53].mxu1  ;;  %v2499_v53 = vpack.c.bf16 %v2455_v37, %v2451_v27 }
 0x268   :  { %v3920_v55 = vadd.f32 %v2326_v17, %v5541_v14  ;;  %v2328_v22 = vpop.f32.mrb[54].mxu1  ;;  %v2500_v25 = vpack.c.bf16 %v2456_v34, %v2452_v35 }
 0x269   :  { %v2395_v48 = vmul.f32 0.3, %v3919_v50  ;;  %v3921_v7 = vadd.f32 %v2328_v22, %v5538_v2  ;;  %v2330_v61 = vpop.f32.mrb[55].mxu1 }
 0x26a   :  { %v2396_v28 = vmul.f32 0.3, %v3920_v55  ;;  %v3922_v18 = vadd.f32 %v2330_v61, %v5541_v14  ;;  %3094 = vmatprep.mubr.bf16.mxu0 %v2500_v25 }
 0x26b   :  { %v2399_v9 = vmul.f32 0.3, %v3921_v7  ;;  %3095 = vmatmul.mubr.bf16.gmra.mrb[48].mxu0 %v2499_v53  ;;  %v2459_v62 = vmax.f32 %v3919_v50, %v2395_v48 }
 0x26c   :  { %v2400_v58 = vmul.f32 0.3, %v3922_v18  ;;  %v2460_v51 = vmax.f32 %v3920_v55, %v2396_v28 }
 0x26d   :  { %v2463_v36 = vmax.f32 %v3921_v7, %v2399_v9 }
 0x26e   :  { %v2464_v10 = vmax.f32 %v3922_v18, %v2400_v58  ;;  %v2334_v32 = vpop.f32.mrb[56].mxu1 }
 0x26f   :  { %v3923_v20 = vadd.f32 %v2334_v32, %v5538_v2  ;;  %v2336_v11 = vpop.f32.mrb[57].mxu1  ;;  %v2503_v38 = vpack.c.bf16 %v2463_v36, %v2459_v62 }
 0x270   :  { %v3924_v16 = vadd.f32 %v2336_v11, %v5541_v14  ;;  %v2338_v24 = vpop.f32.mrb[58].mxu1  ;;  %v2504_v4 = vpack.c.bf16 %v2464_v10, %v2460_v51 }
 0x271   :  { %v2403_v45 = vmul.f32 0.3, %v3923_v20  ;;  %v3925_v13 = vadd.f32 %v2338_v24, %v5538_v2  ;;  %v2340_v41 = vpop.f32.mrb[59].mxu1 }
 0x272   :  { %v2404_v56 = vmul.f32 0.3, %v3924_v16  ;;  %v3926_v1 = vadd.f32 %v2340_v41, %v5541_v14  ;;  %3104 = vmatprep.mubr.bf16.mxu0 %v2504_v4 }
 0x273   :  { %v2407_v19 = vmul.f32 0.3, %v3925_v13  ;;  %3105 = vmatmul.mubr.bf16.gmra.mrb[52].mxu0 %v2503_v38  ;;  %v2467_v46 = vmax.f32 %v3923_v20, %v2403_v45 }
 0x274   :  { %v2408_v60 = vmul.f32 0.3, %v3926_v1  ;;  %v2468_v15 = vmax.f32 %v3924_v16, %v2404_v56 }
 0x275   :  { %v2471_v23 = vmax.f32 %v3925_v13, %v2407_v19 }
 0x276   :  { %v2472_v63 = vmax.f32 %v3926_v1, %v2408_v60  ;;  %v2344_v54 = vpop.f32.mrb[60].mxu1 }
 0x277   :  { %v3927_v21 = vadd.f32 %v2344_v54, %v5538_v2  ;;  %v2346_v31 = vpop.f32.mrb[61].mxu1  ;;  %v2507_v0 = vpack.c.bf16 %v2471_v23, %v2467_v46 }
 0x278   :  { %v3928_v33 = vadd.f32 %v2346_v31, %v5541_v14  ;;  %v2348_v30 = vpop.f32.mrb[62].mxu1  ;;  %v2508_v42 = vpack.c.bf16 %v2472_v63, %v2468_v15 }
 0x279   :  { %v2411_v40 = vmul.f32 0.3, %v3927_v21  ;;  %v3929_v8 = vadd.f32 %v2348_v30, %v5538_v2  ;;  %v2350_v43 = vpop.f32.mrb[63].mxu1  ;;  %v2577_v2 = vld [vmem:[%s5718_s4] sm:$0x3] }
 0x27a   :  { %v2412_v29 = vmul.f32 0.3, %v3928_v33  ;;  %v3930_v52 = vadd.f32 %v2350_v43, %v5541_v14  ;;  %3114 = vmatprep.mubr.bf16.mxu0 %v2508_v42  ;;  %v5585_v37 = vrot.slane %v2577_v2, %v5367_v6  ;;  %v5589_v14 = vrot.slane %v2577_v2, %v430_v44 }
 0x27b   :  { %v2415_v26 = vmul.f32 0.3, %v3929_v8  ;;  %3115 = vmatmul.mubr.bf16.gmra.mrb[56].mxu0 %v2507_v0  ;;  %v2475_v57 = vmax.f32 %v3927_v21, %v2411_v40 }
 0x27c   :  { %v2416_v47 = vmul.f32 0.3, %v3930_v52  ;;  %v2476_v3 = vmax.f32 %v3928_v33, %v2412_v29 }
 0x27d   :  { %v2479_v39 = vmax.f32 %v3929_v8, %v2415_v26 }
 0x27e   :  { %v2480_v49 = vmax.f32 %v3930_v52, %v2416_v47 }
 0x27f   :  { %v2511_v12 = vpack.c.bf16 %v2479_v39, %v2475_v57 }
 0x280   :  { %v2512_v27 = vpack.c.bf16 %v2480_v49, %v2476_v3 }
 0x282   :  { %3124 = vmatprep.mubr.bf16.mxu0 %v2512_v27 }
 0x283   :  { %3125 = vmatmul.mubr.bf16.gmra.mrb[60].mxu0 %v2511_v12 }
 0x31e   :  { %v3056_v35 = vpop.f32.mrb[32].mxu0 }
 0x31f   :  { %v3931_v34 = vadd.f32 %v3056_v35, %v5585_v37  ;;  %v3058_v5 = vpop.f32.mrb[33].mxu0 }
 0x320   :  { %v3932_v50 = vadd.f32 %v3058_v5, %v5589_v14  ;;  %v3060_v17 = vpop.f32.mrb[34].mxu0 }
 0x321   :  { %v3135_v53 = vmul.f32 0.3, %v3931_v34  ;;  %v3933_v55 = vadd.f32 %v3060_v17, %v5585_v37  ;;  %v3062_v22 = vpop.f32.mrb[35].mxu0 }
 0x322   :  { %v3136_v25 = vmul.f32 0.3, %v3932_v50  ;;  %v3934_v48 = vadd.f32 %v3062_v22, %v5589_v14 }
 0x323   :  { %v3167_v7 = vmax.f32 %v3931_v34, %v3135_v53  ;;  %v3137_v61 = vmul.f32 0.3, %v3933_v55 }
 0x324   :  { %v3168_v28 = vmax.f32 %v3932_v50, %v3136_v25  ;;  %v3138_v59 = vmul.f32 0.3, %v3934_v48 }
 0x325   :  { %3199 = vxpose.xlu0.b32.start [1/16] %v3167_v7, 128  ;;  %v3169_v18 = vmax.f32 %v3933_v55, %v3137_v61 }
 0x326   :  { %v3066_v44 = vpop.f32.mrb[36].mxu0  ;;  %3231 = vxpose.xlu1.b32.start [1/16] %v3168_v28, 128  ;;  %v3170_v62 = vmax.f32 %v3934_v48, %v3138_v59 }
 0x327   :  { %v3935_v9 = vadd.f32 %v3066_v44, %v5585_v37  ;;  %v3068_v58 = vpop.f32.mrb[37].mxu0 }
 0x328   :  { %v3936_v36 = vadd.f32 %v3068_v58, %v5589_v14  ;;  %v3070_v51 = vpop.f32.mrb[38].mxu0 }
 0x329   :  { %v3139_v10 = vmul.f32 0.3, %v3935_v9  ;;  %v3937_v32 = vadd.f32 %v3070_v51, %v5585_v37  ;;  %v3072_v20 = vpop.f32.mrb[39].mxu0  ;;  %3200 = vxpose.xlu0.b32.cont [2/16] %v3169_v18, 128 }
 0x32a   :  { %v3140_v11 = vmul.f32 0.3, %v3936_v36  ;;  %v3938_v38 = vadd.f32 %v3072_v20, %v5589_v14  ;;  %3232 = vxpose.xlu1.b32.cont [2/16] %v3170_v62, 128 }
 0x32b   :  { %v3171_v16 = vmax.f32 %v3935_v9, %v3139_v10  ;;  %v3141_v24 = vmul.f32 0.3, %v3937_v32 }
 0x32c   :  { %v3172_v4 = vmax.f32 %v3936_v36, %v3140_v11  ;;  %v3142_v45 = vmul.f32 0.3, %v3938_v38  ;;  %v5613_v11 = vpop.permute.xlu1 %3302 }
 0x32d   :  { %3201 = vxpose.xlu0.b32.cont [3/16] %v3171_v16, 128  ;;  %v3173_v41 = vmax.f32 %v3937_v32, %v3141_v24 }
 0x32e   :  { %v3076_v13 = vpop.f32.mrb[40].mxu0  ;;  %3233 = vxpose.xlu1.b32.cont [3/16] %v3172_v4, 128  ;;  %v3174_v19 = vmax.f32 %v3938_v38, %v3142_v45 }
 0x32f   :  { %v3939_v56 = vadd.f32 %v3076_v13, %v5585_v37  ;;  %v3078_v1 = vpop.f32.mrb[41].mxu0 }
 0x330   :  { %v3940_v60 = vadd.f32 %v3078_v1, %v5589_v14  ;;  %v3080_v46 = vpop.f32.mrb[42].mxu0 }
 0x331   :  { %v3143_v23 = vmul.f32 0.3, %v3939_v56  ;;  %v3941_v15 = vadd.f32 %v3080_v46, %v5585_v37  ;;  %v3082_v63 = vpop.f32.mrb[43].mxu0  ;;  %3202 = vxpose.xlu0.b32.cont [4/16] %v3173_v41, 128 }
 0x332   :  { %v3144_v54 = vmul.f32 0.3, %v3940_v60  ;;  %v3942_v21 = vadd.f32 %v3082_v63, %v5589_v14  ;;  %3234 = vxpose.xlu1.b32.cont [4/16] %v3174_v19, 128 }
 0x333   :  { %v3175_v31 = vmax.f32 %v3939_v56, %v3143_v23  ;;  %v3145_v0 = vmul.f32 0.3, %v3941_v15 }
 0x334   :  { %v3176_v33 = vmax.f32 %v3940_v60, %v3144_v54  ;;  %v3146_v30 = vmul.f32 0.3, %v3942_v21  ;;  %v5617_v60 = vpop.permute.xlu1 %3307 }
 0x335   :  { %3203 = vxpose.xlu0.b32.cont [5/16] %v3175_v31, 128  ;;  %v3177_v40 = vmax.f32 %v3941_v15, %v3145_v0 }
 0x336   :  { %v3086_v42 = vpop.f32.mrb[44].mxu0  ;;  %3235 = vxpose.xlu1.b32.cont [5/16] %v3176_v33, 128  ;;  %v3178_v29 = vmax.f32 %v3942_v21, %v3146_v30 }
 0x337   :  { %v3943_v8 = vadd.f32 %v3086_v42, %v5585_v37  ;;  %v3088_v43 = vpop.f32.mrb[45].mxu0 }
 0x338   :  { %v3944_v52 = vadd.f32 %v3088_v43, %v5589_v14  ;;  %v3090_v26 = vpop.f32.mrb[46].mxu0 }
 0x339   :  { %v3147_v47 = vmul.f32 0.3, %v3943_v8  ;;  %v3945_v57 = vadd.f32 %v3090_v26, %v5585_v37  ;;  %v3092_v39 = vpop.f32.mrb[47].mxu0  ;;  %3204 = vxpose.xlu0.b32.cont [6/16] %v3177_v40, 128  ;;  %v5623_v40 = vpop.permute.xlu0 %3297 }
 0x33a   :  { %v3148_v3 = vmul.f32 0.3, %v3944_v52  ;;  %v3946_v49 = vadd.f32 %v3092_v39, %v5589_v14  ;;  %3236 = vxpose.xlu1.b32.cont [6/16] %v3178_v29, 128  ;;  %v5625_v26 = vpop.permute.xlu1 %3312 }
 0x33b   :  { %v3179_v12 = vmax.f32 %v3943_v8, %v3147_v47  ;;  %v3149_v27 = vmul.f32 0.3, %v3945_v57 }
 0x33c   :  { %v3180_v2 = vmax.f32 %v3944_v52, %v3148_v3  ;;  %v3150_v35 = vmul.f32 0.3, %v3946_v49 }
 0x33d   :  { %3205 = vxpose.xlu0.b32.cont [7/16] %v3179_v12, 128  ;;  %v3181_v5 = vmax.f32 %v3945_v57, %v3149_v27 }
 0x33e   :  { %v3096_v34 = vpop.f32.mrb[48].mxu0  ;;  %3237 = vxpose.xlu1.b32.cont [7/16] %v3180_v2, 128  ;;  %v3182_v53 = vmax.f32 %v3946_v49, %v3150_v35  ;;  %v5629_v2 = vpop.permute.xlu0 %3322 }
 0x33f   :  { %v3947_v50 = vadd.f32 %v3096_v34, %v5585_v37  ;;  %v3098_v17 = vpop.f32.mrb[49].mxu0 }
 0x340   :  { %v3948_v55 = vadd.f32 %v3098_v17, %v5589_v14  ;;  %v3100_v22 = vpop.f32.mrb[50].mxu0 }
 0x341   :  { %v3151_v25 = vmul.f32 0.3, %v3947_v50  ;;  %v3949_v48 = vadd.f32 %v3100_v22, %v5585_v37  ;;  %v3102_v7 = vpop.f32.mrb[51].mxu0  ;;  %3206 = vxpose.xlu0.b32.cont [8/16] %v3181_v5, 128 }
 0x342   :  { %v3152_v61 = vmul.f32 0.3, %v3948_v55  ;;  %v3950_v28 = vadd.f32 %v3102_v7, %v5589_v14  ;;  %3238 = vxpose.xlu1.b32.cont [8/16] %v3182_v53, 128  ;;  %v3318_v53 = vpop.permute.xlu1 %3317  ;;  %v3333_v7 = vpop.permute.xlu0 %3332 }
 0x343   :  { %v3183_v59 = vmax.f32 %v3947_v50, %v3151_v25  ;;  %v3153_v44 = vmul.f32 0.3, %v3949_v48 }
 0x344   :  { %v3184_v18 = vmax.f32 %v3948_v55, %v3152_v61  ;;  %v3154_v9 = vmul.f32 0.3, %v3950_v28 }
 0x345   :  { %3207 = vxpose.xlu0.b32.cont [9/16] %v3183_v59, 128  ;;  %v3185_v62 = vmax.f32 %v3949_v48, %v3153_v44 }
 0x346   :  { %v3106_v58 = vpop.f32.mrb[52].mxu0  ;;  %3239 = vxpose.xlu1.b32.cont [9/16] %v3184_v18, 128  ;;  %v3186_v10 = vmax.f32 %v3950_v28, %v3154_v9  ;;  %v3328_v59 = vpop.permute.xlu1 %3327 }
 0x347   :  { %v3951_v36 = vadd.f32 %v3106_v58, %v5585_v37  ;;  %v3108_v51 = vpop.f32.mrb[53].mxu0 }
 0x348   :  { %v3952_v32 = vadd.f32 %v3108_v51, %v5589_v14  ;;  %v3110_v20 = vpop.f32.mrb[54].mxu0 }
 0x349   :  { %v3155_v38 = vmul.f32 0.3, %v3951_v36  ;;  %v3953_v16 = vadd.f32 %v3110_v20, %v5585_v37  ;;  %v3112_v24 = vpop.f32.mrb[55].mxu0  ;;  %3208 = vxpose.xlu0.b32.cont [10/16] %v3185_v62, 128 }
 0x34a   :  { %v3156_v4 = vmul.f32 0.3, %v3952_v32  ;;  %v3954_v45 = vadd.f32 %v3112_v24, %v5589_v14  ;;  %3240 = vxpose.xlu1.b32.cont [10/16] %v3186_v10, 128  ;;  %v3338_v44 = vpop.permute.xlu1 %3337  ;;  %v3524_v10 = vld [vmem:[#allocation2] sm:$0x1] }
 0x34b   :  { %v3187_v13 = vmax.f32 %v3951_v36, %v3155_v38  ;;  %v3157_v41 = vmul.f32 0.3, %v3953_v16 }
 0x34c   :  { %v3188_v56 = vmax.f32 %v3952_v32, %v3156_v4  ;;  %v3158_v1 = vmul.f32 0.3, %v3954_v45 }
 0x34d   :  { %3209 = vxpose.xlu0.b32.cont [11/16] %v3187_v13, 128  ;;  %v3189_v46 = vmax.f32 %v3953_v16, %v3157_v41  ;;  %v3294_v16 = vld [vmem:[%s5719_s5 + $0xf8] sm:$0xff]  ;;  %s4638_s5 = smov [#allocation8]  }
 0x34e   :  { %v3116_v19 = vpop.f32.mrb[56].mxu0  ;;  %3241 = vxpose.xlu1.b32.cont [11/16] %v3188_v56, 128  ;;  %v3190_v63 = vmax.f32 %v3954_v45, %v3158_v1  ;;  %v3348_v9 = vpop.permute.xlu1 %3347  ;;  %s3548_s28 = sshll.u32 %s4638_s5, 4  ;;  %s3549_s28 = int_to_ptr.vmem [resolvable:$true] %s3548_s28 }
 0x34f   :  { %v3955_v23 = vadd.f32 %v3116_v19, %v5585_v37  ;;  %v3118_v15 = vpop.f32.mrb[57].mxu0  ;;  %s4603_s3 = scalar_lea.vmem %s3549_s28, 16  ;;  %s4607_s29 = scalar_lea.vmem %s3549_s28, 32 }
 0x350   :  { %v3956_v54 = vadd.f32 %v3118_v15, %v5589_v14  ;;  %v3120_v21 = vpop.f32.mrb[58].mxu0  ;;  %p4604_p2 = scmp.ne.s32.totalorder %s3549_s28, %s4603_s3  ;;  %p4608_p3 = scmp.lt.s32.totalorder %s3549_s28, %s3549_s28 }
 0x351   :  { %v3159_v31 = vmul.f32 0.3, %v3955_v23  ;;  %v3957_v0 = vadd.f32 %v3120_v21, %v5585_v37  ;;  %v3122_v33 = vpop.f32.mrb[59].mxu0  ;;  %3210 = vxpose.xlu0.b32.cont [12/16] %v3189_v46, 128  ;;  %p4609_p4 = scmp.lt.s32.totalorder %s4607_s29, %s4603_s3 }
 0x352   :  { %v3160_v30 = vmul.f32 0.3, %v3956_v54  ;;  %v3958_v42 = vadd.f32 %v3122_v33, %v5589_v14  ;;  %3242 = vxpose.xlu1.b32.cont [12/16] %v3190_v63, 128  ;;  %v5637_v58 = vpop.permute.xlu1 %3357 }
 0x353   :  { %v3191_v8 = vmax.f32 %v3955_v23, %v3159_v31  ;;  %v3161_v43 = vmul.f32 0.3, %v3957_v0  ;;  %p4610_p5 = por %p4609_p4, %p4608_p3 }
 0x354   :  { %v3192_v29 = vmax.f32 %v3956_v54, %v3160_v30  ;;  %v3162_v52 = vmul.f32 0.3, %v3958_v42 }
 0x355   :  { %3211 = vxpose.xlu0.b32.cont [13/16] %v3191_v8, 128  ;;  %v3193_v57 = vmax.f32 %v3957_v0, %v3161_v43  ;;  %p4611_p6 = pnand %p4610_p5, %p4604_p2 }
 0x356   :  { %v3126_v47 = vpop.f32.mrb[60].mxu0  ;;  %3243 = vxpose.xlu1.b32.cont [13/16] %v3192_v29, 128  ;;  %v3194_v49 = vmax.f32 %v3958_v42, %v3162_v52  ;;  %v5641_v36 = vpop.permute.xlu1 %3367 }
 0x357   :  { %v3959_v39 = vadd.f32 %v3126_v47, %v5585_v37  ;;  %v3128_v3 = vpop.f32.mrb[61].mxu0 }
 0x358   :  { %v3960_v12 = vadd.f32 %v3128_v3, %v5589_v14  ;;  %v3130_v27 = vpop.f32.mrb[62].mxu0 }
 0x359   :  { %v3163_v35 = vmul.f32 0.3, %v3959_v39  ;;  %v3961_v34 = vadd.f32 %v3130_v27, %v5585_v37  ;;  %v3132_v5 = vpop.f32.mrb[63].mxu0  ;;  %3212 = vxpose.xlu0.b32.cont [14/16] %v3193_v57, 128  ;;  %v3343_v37 = vpop.permute.xlu0 %3342 }
 0x35a   :  { %v3164_v50 = vmul.f32 0.3, %v3960_v12  ;;  %v3962_v17 = vadd.f32 %v3132_v5, %v5589_v14  ;;  %3244 = vxpose.xlu1.b32.cont [14/16] %v3194_v49, 128  ;;  %v5645_v32 = vpop.permute.xlu1 %3377 }
 0x35b   :  { %v3195_v55 = vmax.f32 %v3959_v39, %v3163_v35  ;;  %v3165_v22 = vmul.f32 0.3, %v3961_v34 }
 0x35c   :  { %v3196_v25 = vmax.f32 %v3960_v12, %v3164_v50  ;;  %v3166_v48 = vmul.f32 0.3, %v3962_v17 }
 0x35d   :  { %3213 = vxpose.xlu0.b32.cont [15/16] %v3195_v55, 128  ;;  %v3197_v61 = vmax.f32 %v3961_v34, %v3165_v22  ;;  %v5633_v18 = vpop.permute.xlu0 %3352 }
 0x35e   :  { %3245 = vxpose.xlu1.b32.cont [15/16] %v3196_v25, 128  ;;  %v3198_v28 = vmax.f32 %v3962_v17, %v3166_v48  ;;  %v5649_v38 = vpop.permute.xlu1 %3387 }
 0x361   :  { %3214 = vxpose.xlu0.b32.end [16/16] %v3197_v61, 128  ;;  %v5635_v14 = vpop.permute.xlu0 %3362 }
 0x362   :  { %3246 = vxpose.xlu1.b32.end [16/16] %v3198_v28, 128  ;;  %v5656_v4 = vpop.permute.xlu1 %3397 }
 0x365   :  { %v5639_v62 = vpop.permute.xlu0 %3372 }
 0x366   :  { %v5660_v13 = vpop.permute.xlu1 %3407 }
 0x369   :  { %v5643_v51 = vpop.permute.xlu0 %3382 }
 0x36a   :  { %v5664_v56 = vpop.permute.xlu1 %3417 }
 0x36d   :  { %v5647_v20 = vpop.permute.xlu0 %3392 }
 0x36e   :  { %v5668_v19 = vpop.permute.xlu1 %3427 }
 0x371   :  { %v5654_v24 = vpop.permute.xlu0 %3402 }
 0x372   :  { %v5672_v23 = vpop.permute.xlu1 %3437 }
 0x375   :  { %v5658_v45 = vpop.permute.xlu0 %3412 }
 0x376   :  { %v5674_v63 = vpop.permute.xlu1 %3447 }
 0x379   :  { %v5662_v41 = vpop.permute.xlu0 %3422 }
 0x37d   :  { %v5666_v1 = vpop.permute.xlu0 %3432 }
 0x380   :  { %3527 = vperm.xlu1 %4164, %v3524_v10  }
 0x381   :  { %v5670_v46 = vpop.permute.xlu0 %3442 }
 0x38a   :  { %3452 = vperm.xlu0 %4163, %v3294_v16  }
 0x3a5   :  { %v3215_v15 = vpop.trf.xlu0 }
 0x3a6   :  { %v3247_v31 = vpop.trf.xlu1  ;;  %v3455_v33 = vmul.f32 %v5623_v40, %v3215_v15 }
 0x3a9   :  { %v3216_v54 = vpop.trf.xlu0 }
 0x3aa   :  { %v3456_v21 = vmul.f32 %v5613_v11, %v3216_v54  ;;  %v3248_v52 = vpop.trf.xlu1 }
 0x3ac   :  { %v3487_v42 = vadd.f32 %v3456_v21, %v3455_v33 }
 0x3ad   :  { %v3217_v0 = vpop.trf.xlu0 }
 0x3ae   :  { %v3457_v30 = vmul.f32 %v5617_v60, %v3217_v0  ;;  %v3249_v39 = vpop.trf.xlu1 }
 0x3b0   :  { %v3488_v43 = vadd.f32 %v3487_v42, %v3457_v30 }
 0x3b1   :  { %v3218_v8 = vpop.trf.xlu0 }
 0x3b2   :  { %v3458_v29 = vmul.f32 %v5625_v26, %v3218_v8  ;;  %v3250_v12 = vpop.trf.xlu1 }
 0x3b4   :  { %v3489_v47 = vadd.f32 %v3488_v43, %v3458_v29 }
 0x3b5   :  { %v3219_v57 = vpop.trf.xlu0 }
 0x3b6   :  { %v3251_v11 = vpop.trf.xlu1  ;;  %v3459_v5 = vmul.f32 %v3318_v53, %v3219_v57 }
 0x3b8   :  { %v3490_v17 = vadd.f32 %v3489_v47, %v3459_v5  ;;  %v3474_v5 = vmul.f32 %v5647_v20, %v3250_v12 }
 0x3b9   :  { %v3220_v3 = vpop.trf.xlu0 }
 0x3ba   :  { %v3252_v40 = vpop.trf.xlu1  ;;  %v3460_v60 = vmul.f32 %v5629_v2, %v3220_v3 }
 0x3bc   :  { %v3491_v22 = vadd.f32 %v3490_v17, %v3460_v60  ;;  %v3476_v17 = vmul.f32 %v5654_v24, %v3252_v40 }
 0x3bd   :  { %v3221_v49 = vpop.trf.xlu0 }
 0x3be   :  { %v3461_v55 = vmul.f32 %v3328_v59, %v3221_v49  ;;  %v3253_v25 = vpop.trf.xlu1 }
 0x3c0   :  { %v3492_v61 = vadd.f32 %v3491_v22, %v3461_v55 }
 0x3c1   :  { %v3222_v27 = vpop.trf.xlu0 }
 0x3c2   :  { %v3462_v26 = vmul.f32 %v3333_v7, %v3222_v27  ;;  %v3254_v0 = vpop.trf.xlu1  ;;  %v3472_v27 = vmul.f32 %v5643_v51, %v3248_v52 }
 0x3c3   :  { %v3478_v51 = vmul.f32 %v5658_v45, %v3254_v0 }
 0x3c4   :  { %v3493_v10 = vadd.f32 %v3492_v61, %v3462_v26 }
 0x3c5   :  { %v3223_v35 = vpop.trf.xlu0 }
 0x3c6   :  { %v3463_v28 = vmul.f32 %v3338_v44, %v3223_v35  ;;  %v3255_v8 = vpop.trf.xlu1  ;;  %v3473_v35 = vmul.f32 %v5649_v38, %v3249_v39 }
 0x3c7   :  { %v3479_v38 = vmul.f32 %v5664_v56, %v3255_v8 }
 0x3c8   :  { %v3494_v54 = vadd.f32 %v3493_v10, %v3463_v28 }
 0x3c9   :  { %v3224_v34 = vpop.trf.xlu0 }
 0x3ca   :  { %v3464_v16 = vmul.f32 %v3343_v37, %v3224_v34  ;;  %v3256_v3 = vpop.trf.xlu1 }
 0x3cb   :  { %v3480_v20 = vmul.f32 %v5662_v41, %v3256_v3 }
 0x3cc   :  { %v3495_v33 = vadd.f32 %v3494_v54, %v3464_v16 }
 0x3cd   :  { %v3225_v50 = vpop.trf.xlu0 }
 0x3ce   :  { %v3465_v21 = vmul.f32 %v3348_v9, %v3225_v50  ;;  %v3257_v34 = vpop.trf.xlu1 }
 0x3d0   :  { %v3496_v2 = vadd.f32 %v3495_v33, %v3465_v21 }
 0x3d1   :  { %v3226_v48 = vpop.trf.xlu0 }
 0x3d2   :  { %v3466_v53 = vmul.f32 %v5633_v18, %v3226_v48  ;;  %v3471_v18 = vmul.f32 %v5645_v32, %v3247_v31  ;;  %v3258_v55 = vpop.trf.xlu1  ;;  %v3477_v32 = vmul.f32 %v5660_v13, %v3253_v25 }
 0x3d3   :  { %v3482_v24 = vmul.f32 %v5666_v1, %v3258_v55 }
 0x3d4   :  { %v3497_v59 = vadd.f32 %v3496_v2, %v3466_v53 }
 0x3d5   :  { %v3227_v15 = vpop.trf.xlu0 }
 0x3d6   :  { %v3467_v42 = vmul.f32 %v5637_v58, %v3227_v15  ;;  %v3259_v22 = vpop.trf.xlu1 }
 0x3d7   :  { %v3483_v13 = vmul.f32 %v5672_v23, %v3259_v22 }
 0x3d8   :  { %v3498_v29 = vadd.f32 %v3497_v59, %v3467_v42 }
 0x3d9   :  { %v3228_v30 = vpop.trf.xlu0 }
 0x3da   :  { %v3468_v7 = vmul.f32 %v5635_v14, %v3228_v30  ;;  %v3260_v26 = vpop.trf.xlu1 }
 0x3db   :  { %v3484_v45 = vmul.f32 %v5670_v46, %v3260_v26 }
 0x3dc   :  { %v3499_v37 = vadd.f32 %v3498_v29, %v3468_v7 }
 0x3dd   :  { %v3229_v43 = vpop.trf.xlu0 }
 0x3de   :  { %v3469_v44 = vmul.f32 %v5641_v36, %v3229_v43  ;;  %v3475_v36 = vmul.f32 %v5656_v4, %v3251_v11  ;;  %v3481_v4 = vmul.f32 %v5668_v19, %v3257_v34  ;;  %v3261_v56 = vpop.trf.xlu1 }
 0x3df   :  { %v3485_v28 = vmul.f32 %v5674_v63, %v3261_v56 }
 0x3e0   :  { %v3500_v57 = vadd.f32 %v3499_v37, %v3469_v44 }
 0x3e1   :  { %v3230_v47 = vpop.trf.xlu0 }
 0x3e2   :  { %v3470_v9 = vmul.f32 %v5639_v62, %v3230_v47  ;;  %v3262_v10 = vpop.trf.xlu1 }
 0x3e4   :  { %v3501_v49 = vadd.f32 %v3500_v57, %v3470_v9 }
 0x3e6   :  { %v3502_v58 = vadd.f32 %v3501_v49, %v3471_v18 }
 0x3e8   :  { %v3503_v14 = vadd.f32 %v3502_v58, %v3472_v27 }
 0x3ea   :  { %v3504_v60 = vadd.f32 %v3503_v14, %v3473_v35 }
 0x3ec   :  { %v3505_v50 = vadd.f32 %v3504_v60, %v3474_v5 }
 0x3ee   :  { %v3506_v62 = vadd.f32 %v3505_v50, %v3475_v36 }
 0x3f0   :  { %v3507_v31 = vadd.f32 %v3506_v62, %v3476_v17 }
 0x3f2   :  { %v3508_v52 = vadd.f32 %v3507_v31, %v3477_v32 }
 0x3f4   :  { %v3509_v39 = vadd.f32 %v3508_v52, %v3478_v51 }
 0x3f6   :  { %v3510_v12 = vadd.f32 %v3509_v39, %v3479_v38 }
 0x3f8   :  { %v3511_v11 = vadd.f32 %v3510_v12, %v3480_v20 }
 0x3fa   :  { %v3512_v40 = vadd.f32 %v3511_v11, %v3481_v4 }
 0x3fc   :  { %v3513_v25 = vadd.f32 %v3512_v40, %v3482_v24 }
 0x3fe   :  { %v3514_v48 = vadd.f32 %v3513_v25, %v3483_v13 }
 0x3ff   :  { %v3528_v33 = vpop.permute.xlu1 %3527 }
 0x400   :  { %v3515_v61 = vadd.f32 %v3514_v48, %v3484_v45  ;;  %v3533_v23 = vrot.slane %v3528_v33, %v5367_v6 }
 0x402   :  { %v3516_v16 = vadd.f32 %v3515_v61, %v3485_v28 }
 0x409   :  { %v3453_v41 = vpop.permute.xlu0 %3452 }
 0x40a   :  { %v3486_v15 = vmul.f32 %v3453_v41, %v3262_v10 }
 0x40c   :  { %v3517_v19 = vadd.f32 %v3516_v16, %v3486_v15 }
 0x40e   :  { %v3518_v54 = vrot.slane %v3517_v19, 4 }
 0x410   :  { %v3519_v21 = vadd.f32 %v3518_v54, %v3517_v19 }
 0x412   :  { %v3520_v1 = vrot.slane %v3519_v21, 2 }
 0x414   :  { %v3521_v0 = vadd.f32 %v3520_v1, %v3519_v21 }
 0x416   :  { %v3522_v53 = vrot.slane %v3521_v0, 1 }
 0x418   :  { %v3523_v30 = vadd.f32 %v3522_v53, %v3521_v0 }
 0x41a   :  { %v3534_v46 = vadd.f32 %v3533_v23, %v3523_v30 }
 0x41c   :  { %v3834_v2 = vmul.f32 -1.442695, %v3534_v46 }
 0x41e   :  { %4555 = vpow2.f32 %v3834_v2 }
 0x428   :  { %v4556_v42 = vpop.eup %4555 }
 0x429   :  { %v3538_v59 = vadd.f32 1.0, %v4556_v42 }
 0x42b   :  { %4557 = vrcp.f32 %v3538_v59 }
 0x435   :  { %v4558_v63 = vpop.eup %4557 }
 0x436   :  { %3541 = vst [vmem:[#allocation8] sm:$0x1] %v4558_v63 }
 0x437   :  { %4614 = shalt.err (!%p4611_p6)
}
 0x438   :  { %s4615_s9 = scalar_lea.hbm %s5721_s7, 16 }
 0x439   :  { %p4616_p7 = scmp.ne.s32.totalorder %s5721_s7, %s4615_s9  ;;  %p4619_p8 = scmp.lt.u32.totalorder %s4615_s9, %s5721_s7 }
 0x43b   :  { %p4621_p9 = pnand %p4619_p8, %p4616_p7 }
 0x43d   :  { %4624 = shalt.err (!%p4621_p9)
}
 0x43e   :  { %3551 = dma.vmem_to_hbm [thread:$0]  %s3549_s28, 16, %s5721_s7, [#allocation5]  }
 0x43f   :  { %4629 = dma.done.wait [#allocation5], 16  }
 0x440   :  { %4630 = vsyncadd [#allocation5], 4294967280 }
 0x441   :  { %3555 = vsyncpa [#allocation4], 1 }
 0x442   :  { %3556 = vsyncpa [#allocation7], 1 }
 0x443   :  { %3557 = vsyncpa [#allocation5], 1 }

</bundles_post_ra>
